<compile_context>
chip_gen: v5e
topology: v5e:2x2
jax: 0.10.0
libtpu: 0.0.40
codegen_flags: <defaults>
</compile_context>

<pallas_src>
import jax
import jax.numpy as jnp
from jax.experimental import pallas as pl
from jax.experimental.pallas import tpu as pltpu

LANE = 128  # TPU lane width; GRU gates are padded to start on lane boundaries.


def selfmatcher_kernel(v_ref, v_dense_ref, proj_slab_ref, gru_slab_ref, hs_ref):
    l, b, d = v_ref.shape
    hdim = hs_ref.shape[2]
    bh = b * hdim
    g3 = 3 * LANE

    # ---- static, aligned views into the packed parameter slabs ------------
    w_proj_bd = proj_slab_ref[:, 0:2 * bh]              # (b*d, 2*b*h) block-diag [Wp|Wp_]
    s_v = proj_slab_ref[:, 2 * bh:2 * bh + b]           # (b*h, b)  V folded into h-reduce
    r_whh = d
    r_bih = ((d + hdim + 7) // 8) * 8
    r_bhh = r_bih + 8
    r_h0 = r_bhh + 8
    wih_t_pad = gru_slab_ref[0:d, :]                    # (d, 3*LANE) gate-aligned
    whh_t_pad = gru_slab_ref[r_whh:r_whh + hdim, :]     # (h, 3*LANE)
    bih_pad = gru_slab_ref[r_bih:r_bih + 1, :]          # (1, 3*LANE)
    bhh_pad = gru_slab_ref[r_bhh:r_bhh + 1, :]          # (1, 3*LANE)
    h0 = gru_slab_ref[r_h0:r_h0 + b, 0:hdim]            # (b, h)

    # =============== Phase 1: h-independent work, batched, lane-dense ======
    # Block-diagonal fused projection: output lands directly in (l, b*h)
    # 256-lane-dense layout - no sublane->lane reshape needed.
    proj = jnp.dot(v_dense_ref[...], w_proj_bd,
                   preferred_element_type=jnp.float32)  # (l, 2*b*h)
    wpv = proj[:, 0:bh]                                 # Wp  v_i   (l, b*h)
    wpv_ = proj[:, bh:2 * bh]                           # Wp_ v_j   (l, b*h)

    # All-pairs tanh, lane dense: x[j, i, b*h] = tanh(Wp_ v_j + Wp v_i).
    x = jnp.tanh(wpv_[:, None, :] + wpv[None, :, :])    # (l, l, b*h) = 16 vregs

    # s[j, i, b] = sum_h x * V   -- done on the MXU via the V-folded block
    # matrix s_v; the leading-dim merge (j,i)->rows is layout-free.
    s = jnp.dot(x.reshape(l * l, bh), s_v,
                preferred_element_type=jnp.float32).reshape(l, l, b)

    # Softmax over the key axis j (leading dim -> cheap reductions, exact recip).
    s_max = jnp.max(s, axis=0, keepdims=True)
    e = jnp.exp(s - s_max)
    denom = jnp.sum(e, axis=0, keepdims=True)
    a = e * pl.reciprocal(denom, approx=False)          # (j, i, b)

    # Context c[i, b, :] = sum_j a[j, i, b] * v[j, b, :]
    # accumulated over j -- never materializes the 4-D (j,i,b,d) product.
    aT = a[:, :, :, None]                               # (j, i, b, 1)
    v = v_ref[...]                                      # (l, b, d)
    c = jnp.zeros((l, b, d), jnp.float32)
    for j in range(l):            # static unroll, l known at trace time
        c = c + aT[j] * v[j][None, :, :]                # (i, b, d)

    # Input-side GRU gates for every step: one MXU pass, gate-aligned lanes.
    gi_all = (jnp.dot(c.reshape(l * b, d), wih_t_pad,
                      preferred_element_type=jnp.float32)
              + bih_pad).reshape(l, b, g3)              # (l, b, 3*LANE)

    # =============== Phase 2: the only sequential part, the h recurrence ===
    # All gate slices start at lane offsets 0 / 128 / 256 -> no lane rotates
    # on the serial dependency chain.
    h = h0
    for i in range(l):            # static unroll
        gi = gi_all[i]                                  # (b, 3*LANE), free index
        gh = jnp.dot(h, whh_t_pad,
                     preferred_element_type=jnp.float32) + bhh_pad
        r = jax.nn.sigmoid(gi[:, 0:hdim] + gh[:, 0:hdim])
        z = jax.nn.sigmoid(gi[:, LANE:LANE + hdim] + gh[:, LANE:LANE + hdim])
        n = jnp.tanh(gi[:, 2 * LANE:2 * LANE + hdim]
                     + r * gh[:, 2 * LANE:2 * LANE + hdim])
        h = (1.0 - z) * n + z * h
        hs_ref[i] = h             # VMEM-resident output, one HBM writeback


def self_matcher(v, params):
    l, b, d = v.shape
    hdim = params["h0"].shape[1]
    assert hdim == d  # module sets hidden_size = in_size
    bh = b * hdim
    g3 = 3 * LANE
    f32 = jnp.float32
    eye_b = jnp.eye(b, dtype=f32)

    # ---- attention slab: block-diag fused projection weight + V-folded
    #      h-reduction matrix, one (b*d, 2*b*h + b) array ---------------------
    w_bd = jnp.concatenate(
        [jnp.kron(eye_b, params["wp_t"]), jnp.kron(eye_b, params["wp__t"])],
        axis=1)                                          # (b*d, 2*b*h)
    s_v = (eye_b[:, None, :] * params["V"][:, :, None]).reshape(bh, b)
    proj_slab = jnp.concatenate([w_bd, s_v], axis=1)     # (b*d, 2*b*h + b)

    # ---- GRU slab: gate-padded (128-lane-aligned) weights/biases + h0 -------
    def pad_gates(w):  # (rows, 3*h) -> (rows, 3*LANE), gate g at lane g*LANE
        rows = w.shape[0]
        out = jnp.zeros((rows, g3), f32)
        for g in range(3):
            out = out.at[:, g * LANE:g * LANE + hdim].set(
                w[:, g * hdim:(g + 1) * hdim])
        return out

    r_bih = ((d + hdim + 7) // 8) * 8
    r_bhh = r_bih + 8
    r_h0 = r_bhh + 8
    gru_slab = jnp.zeros((r_h0 + b, g3), f32)
    gru_slab = gru_slab.at[0:d, :].set(pad_gates(params["wih_t"]))
    gru_slab = gru_slab.at[d:d + hdim, :].set(pad_gates(params["whh_t"]))
    gru_slab = gru_slab.at[r_bih:r_bih + 1, :].set(pad_gates(params["bih"]))
    gru_slab = gru_slab.at[r_bhh:r_bhh + 1, :].set(pad_gates(params["bhh"]))
    gru_slab = gru_slab.at[r_h0:r_h0 + b, 0:hdim].set(params["h0"])

    # Lane-dense copy of v feeding the block-diag projection (the (l,b,d)
    # copy feeds the context loop; in-kernel conversion would be a relayout).
    v_dense = v.reshape(l, b * d)

    vmem = pl.BlockSpec(memory_space=pltpu.MemorySpace.VMEM)
    hs = pl.pallas_call(
        selfmatcher_kernel,
        out_shape=jax.ShapeDtypeStruct((l, b, hdim), jnp.float32),
        in_specs=[vmem, vmem, vmem, vmem],
        out_specs=vmem,
        compiler_params=pltpu.CompilerParams(
            vmem_limit_bytes=16 * 1024 * 1024),
    )(v, v_dense, proj_slab, gru_slab)
    # Dropout(p=0.2) applied as identity (eval mode).
    return hs


def reference(v, p):
    """Pure-JAX reference mirroring the PyTorch forward."""
    l, b, d = v.shape
    hdim = p["h0"].shape[1]
    wpv_all = v @ p["wp_t"]      # (l, b, h)
    wpv__all = v @ p["wp__t"]    # (l, b, h)
    h = p["h0"]
    hs = []
    for i in range(l):
        x = jnp.tanh(wpv_all[i] + wpv__all)                  # (l, b, h)
        s = jnp.sum(x * p["V"][None], axis=-1)               # (l, b)
        a = jax.nn.softmax(s, axis=0)
        c = jnp.sum(a[:, :, None] * v, axis=0)               # (b, d)
        gi = c @ p["wih_t"] + p["bih"][0]
        gh = h @ p["whh_t"] + p["bhh"][0]
        r = jax.nn.sigmoid(gi[:, :hdim] + gh[:, :hdim])
        z = jax.nn.sigmoid(gi[:, hdim:2 * hdim] + gh[:, hdim:2 * hdim])
        n = jnp.tanh(gi[:, 2 * hdim:] + r * gh[:, 2 * hdim:])
        h = (1.0 - z) * n + z * h
        hs.append(h)
    return jnp.stack(hs, axis=0)


if __name__ == "__main__":
    # Small shapes: seq l=8, batch=8 (module's global batch_size scaled down),
    # in_size = hidden = 32.
    l, batch, in_size = 8, 8, 32
    hidden = in_size

    key = jax.random.PRNGKey(0)
    ks = jax.random.split(key, 9)

    v = jax.random.normal(ks[0], (l, batch, in_size), jnp.float32)

    scale = 1.0 / jnp.sqrt(jnp.float32(hidden))
    params = {
        # Linear weights stored transposed: y = x @ W^T  ->  pass W^T directly.
        "wp_t":  jax.random.uniform(ks[1], (in_size, hidden), jnp.float32, -scale, scale),
        "wp__t": jax.random.uniform(ks[2], (in_size, hidden), jnp.float32, -scale, scale),
        # Random per-forward tensors from the PyTorch module, made deterministic.
        "V":  jax.random.normal(ks[3], (batch, hidden), jnp.float32),
        "h0": jax.random.normal(ks[4], (batch, hidden), jnp.float32),
        # GRUCell parameters (gate order r, z, n), transposed for right-matmul.
        "wih_t": jax.random.uniform(ks[5], (in_size, 3 * hidden), jnp.float32, -scale, scale),
        "whh_t": jax.random.uniform(ks[6], (hidden, 3 * hidden), jnp.float32, -scale, scale),
        "bih": jax.random.uniform(ks[7], (1, 3 * hidden), jnp.float32, -scale, scale),
        "bhh": jax.random.uniform(ks[8], (1, 3 * hidden), jnp.float32, -scale, scale),
    }

    hs = self_matcher(v, params)
    hs = jax.block_until_ready(hs)

    hs_ref = reference(v, params)
    assert hs.shape == (l, batch, hidden)
    assert jnp.allclose(hs, hs_ref, rtol=1e-4, atol=1e-4), (
        f"max err {jnp.max(jnp.abs(hs - hs_ref))}")

    print("KERNEL_OK")
</pallas_src>

<mosaic_0001>
module attributes {stable_mosaic.version = 11 : i64} {
  func.func @selfmatcher_kernel(%arg0: memref<8x8x32xf32, #tpu.memory_space<vmem>>, %arg1: memref<8x256xf32, #tpu.memory_space<vmem>>, %arg2: memref<256x520xf32, #tpu.memory_space<vmem>>, %arg3: memref<88x384xf32, #tpu.memory_space<vmem>>, %arg4: memref<8x8x32xf32, #tpu.memory_space<vmem>>) attributes {dimension_semantics = [], scalar_prefetch = 0 : i64, scratch_operands = 0 : i64, tpu.core_type = #tpu.core_type<tc>} {
    %c0 = arith.constant 0 : index
    %c0_0 = arith.constant 0 : index
    %0 = vector.load %arg2[%c0, %c0_0] : memref<256x520xf32, #tpu.memory_space<vmem>>, vector<256x512xf32>
    %c0_1 = arith.constant 0 : index
    %c512 = arith.constant 512 : index
    %1 = vector.load %arg2[%c0_1, %c512] : memref<256x520xf32, #tpu.memory_space<vmem>>, vector<256x8xf32>
    %c0_2 = arith.constant 0 : index
    %c0_3 = arith.constant 0 : index
    %2 = vector.load %arg3[%c0_2, %c0_3] : memref<88x384xf32, #tpu.memory_space<vmem>>, vector<32x384xf32>
    %c32 = arith.constant 32 : index
    %c0_4 = arith.constant 0 : index
    %3 = vector.load %arg3[%c32, %c0_4] : memref<88x384xf32, #tpu.memory_space<vmem>>, vector<32x384xf32>
    %c64 = arith.constant 64 : index
    %c0_5 = arith.constant 0 : index
    %4 = vector.load %arg3[%c64, %c0_5] : memref<88x384xf32, #tpu.memory_space<vmem>>, vector<1x384xf32>
    %c72 = arith.constant 72 : index
    %c0_6 = arith.constant 0 : index
    %5 = vector.load %arg3[%c72, %c0_6] : memref<88x384xf32, #tpu.memory_space<vmem>>, vector<1x384xf32>
    %c80 = arith.constant 80 : index
    %c0_7 = arith.constant 0 : index
    %6 = vector.load %arg3[%c80, %c0_7] : memref<88x384xf32, #tpu.memory_space<vmem>>, vector<8x32xf32>
    %c0_8 = arith.constant 0 : index
    %c0_9 = arith.constant 0 : index
    %7 = vector.load %arg1[%c0_8, %c0_9] : memref<8x256xf32, #tpu.memory_space<vmem>>, vector<8x256xf32>
    %cst = arith.constant dense<0.000000e+00> : vector<8x512xf32>
    %8 = tpu.matmul %7, %0, %cst {dimension_numbers = #tpu.dot_dimension_numbers<[1], [0], [0], [1], [0, 0, 1, 1], [], []>} : vector<8x256xf32>, vector<256x512xf32>, vector<8x512xf32> -> vector<8x512xf32>
    %9 = vector.extract_strided_slice %8 {offsets = [0, 0], sizes = [8, 256], strides = [1, 1]} : vector<8x512xf32> to vector<8x256xf32>
    %10 = vector.extract_strided_slice %8 {offsets = [0, 256], sizes = [8, 256], strides = [1, 1]} : vector<8x512xf32> to vector<8x256xf32>
    %11 = vector.shape_cast %10 : vector<8x256xf32> to vector<8x1x256xf32>
    %12 = vector.shape_cast %9 : vector<8x256xf32> to vector<1x8x256xf32>
    %13 = vector.broadcast %11 : vector<8x1x256xf32> to vector<8x8x256xf32>
    %14 = vector.broadcast %12 : vector<1x8x256xf32> to vector<8x8x256xf32>
    %15 = arith.addf %13, %14 : vector<8x8x256xf32>
    %16 = math.tanh %15 : vector<8x8x256xf32>
    %17 = vector.shape_cast %16 : vector<8x8x256xf32> to vector<64x256xf32>
    %cst_10 = arith.constant dense<0.000000e+00> : vector<64x8xf32>
    %18 = tpu.matmul %17, %1, %cst_10 {dimension_numbers = #tpu.dot_dimension_numbers<[1], [0], [0], [1], [0, 0, 1, 1], [], []>} : vector<64x256xf32>, vector<256x8xf32>, vector<64x8xf32> -> vector<64x8xf32>
    %19 = vector.shape_cast %18 : vector<64x8xf32> to vector<8x8x8xf32>
    %cst_11 = arith.constant dense<0xFF800000> : vector<8x8xf32>
    %20 = vector.multi_reduction <maximumf>, %19, %cst_11 [0] : vector<8x8x8xf32> to vector<8x8xf32>
    %21 = vector.shape_cast %20 : vector<8x8xf32> to vector<1x8x8xf32>
    %22 = vector.broadcast %21 : vector<1x8x8xf32> to vector<8x8x8xf32>
    %23 = arith.subf %19, %22 : vector<8x8x8xf32>
    %24 = math.exp %23 : vector<8x8x8xf32>
    %cst_12 = arith.constant dense<0.000000e+00> : vector<8x8xf32>
    %25 = vector.multi_reduction <add>, %24, %cst_12 [0] : vector<8x8x8xf32> to vector<8x8xf32>
    %26 = vector.shape_cast %25 : vector<8x8xf32> to vector<1x8x8xf32>
    %27 = tpu.reciprocal %26 : vector<1x8x8xf32> -> vector<1x8x8xf32>
    %28 = vector.broadcast %27 : vector<1x8x8xf32> to vector<8x8x8xf32>
    %29 = arith.mulf %24, %28 : vector<8x8x8xf32>
    %30 = vector.shape_cast %29 : vector<8x8x8xf32> to vector<8x8x8x1xf32>
    %c0_13 = arith.constant 0 : index
    %c0_14 = arith.constant 0 : index
    %c0_15 = arith.constant 0 : index
    %31 = vector.load %arg0[%c0_13, %c0_14, %c0_15] : memref<8x8x32xf32, #tpu.memory_space<vmem>>, vector<8x8x32xf32>
    %cst_16 = arith.constant 0.000000e+00 : f32
    %32 = vector.broadcast %cst_16 : f32 to vector<8x8x32xf32>
    %33 = vector.extract_strided_slice %30 {offsets = [0, 0, 0, 0], sizes = [1, 8, 8, 1], strides = [1, 1, 1, 1]} : vector<8x8x8x1xf32> to vector<1x8x8x1xf32>
    %34 = vector.shape_cast %33 : vector<1x8x8x1xf32> to vector<8x8x1xf32>
    %35 = vector.extract_strided_slice %31 {offsets = [0, 0, 0], sizes = [1, 8, 32], strides = [1, 1, 1]} : vector<8x8x32xf32> to vector<1x8x32xf32>
    %36 = vector.shape_cast %35 : vector<1x8x32xf32> to vector<8x32xf32>
    %37 = vector.shape_cast %36 : vector<8x32xf32> to vector<1x8x32xf32>
    %38 = vector.broadcast %34 : vector<8x8x1xf32> to vector<8x8x32xf32>
    %39 = vector.broadcast %37 : vector<1x8x32xf32> to vector<8x8x32xf32>
    %40 = arith.mulf %38, %39 : vector<8x8x32xf32>
    %41 = arith.addf %32, %40 : vector<8x8x32xf32>
    %42 = vector.extract_strided_slice %30 {offsets = [1, 0, 0, 0], sizes = [1, 8, 8, 1], strides = [1, 1, 1, 1]} : vector<8x8x8x1xf32> to vector<1x8x8x1xf32>
    %43 = vector.shape_cast %42 : vector<1x8x8x1xf32> to vector<8x8x1xf32>
    %44 = vector.extract_strided_slice %31 {offsets = [1, 0, 0], sizes = [1, 8, 32], strides = [1, 1, 1]} : vector<8x8x32xf32> to vector<1x8x32xf32>
    %45 = vector.shape_cast %44 : vector<1x8x32xf32> to vector<8x32xf32>
    %46 = vector.shape_cast %45 : vector<8x32xf32> to vector<1x8x32xf32>
    %47 = vector.broadcast %43 : vector<8x8x1xf32> to vector<8x8x32xf32>
    %48 = vector.broadcast %46 : vector<1x8x32xf32> to vector<8x8x32xf32>
    %49 = arith.mulf %47, %48 : vector<8x8x32xf32>
    %50 = arith.addf %41, %49 : vector<8x8x32xf32>
    %51 = vector.extract_strided_slice %30 {offsets = [2, 0, 0, 0], sizes = [1, 8, 8, 1], strides = [1, 1, 1, 1]} : vector<8x8x8x1xf32> to vector<1x8x8x1xf32>
    %52 = vector.shape_cast %51 : vector<1x8x8x1xf32> to vector<8x8x1xf32>
    %53 = vector.extract_strided_slice %31 {offsets = [2, 0, 0], sizes = [1, 8, 32], strides = [1, 1, 1]} : vector<8x8x32xf32> to vector<1x8x32xf32>
    %54 = vector.shape_cast %53 : vector<1x8x32xf32> to vector<8x32xf32>
    %55 = vector.shape_cast %54 : vector<8x32xf32> to vector<1x8x32xf32>
    %56 = vector.broadcast %52 : vector<8x8x1xf32> to vector<8x8x32xf32>
    %57 = vector.broadcast %55 : vector<1x8x32xf32> to vector<8x8x32xf32>
    %58 = arith.mulf %56, %57 : vector<8x8x32xf32>
    %59 = arith.addf %50, %58 : vector<8x8x32xf32>
    %60 = vector.extract_strided_slice %30 {offsets = [3, 0, 0, 0], sizes = [1, 8, 8, 1], strides = [1, 1, 1, 1]} : vector<8x8x8x1xf32> to vector<1x8x8x1xf32>
    %61 = vector.shape_cast %60 : vector<1x8x8x1xf32> to vector<8x8x1xf32>
    %62 = vector.extract_strided_slice %31 {offsets = [3, 0, 0], sizes = [1, 8, 32], strides = [1, 1, 1]} : vector<8x8x32xf32> to vector<1x8x32xf32>
    %63 = vector.shape_cast %62 : vector<1x8x32xf32> to vector<8x32xf32>
    %64 = vector.shape_cast %63 : vector<8x32xf32> to vector<1x8x32xf32>
    %65 = vector.broadcast %61 : vector<8x8x1xf32> to vector<8x8x32xf32>
    %66 = vector.broadcast %64 : vector<1x8x32xf32> to vector<8x8x32xf32>
    %67 = arith.mulf %65, %66 : vector<8x8x32xf32>
    %68 = arith.addf %59, %67 : vector<8x8x32xf32>
    %69 = vector.extract_strided_slice %30 {offsets = [4, 0, 0, 0], sizes = [1, 8, 8, 1], strides = [1, 1, 1, 1]} : vector<8x8x8x1xf32> to vector<1x8x8x1xf32>
    %70 = vector.shape_cast %69 : vector<1x8x8x1xf32> to vector<8x8x1xf32>
    %71 = vector.extract_strided_slice %31 {offsets = [4, 0, 0], sizes = [1, 8, 32], strides = [1, 1, 1]} : vector<8x8x32xf32> to vector<1x8x32xf32>
    %72 = vector.shape_cast %71 : vector<1x8x32xf32> to vector<8x32xf32>
    %73 = vector.shape_cast %72 : vector<8x32xf32> to vector<1x8x32xf32>
    %74 = vector.broadcast %70 : vector<8x8x1xf32> to vector<8x8x32xf32>
    %75 = vector.broadcast %73 : vector<1x8x32xf32> to vector<8x8x32xf32>
    %76 = arith.mulf %74, %75 : vector<8x8x32xf32>
    %77 = arith.addf %68, %76 : vector<8x8x32xf32>
    %78 = vector.extract_strided_slice %30 {offsets = [5, 0, 0, 0], sizes = [1, 8, 8, 1], strides = [1, 1, 1, 1]} : vector<8x8x8x1xf32> to vector<1x8x8x1xf32>
    %79 = vector.shape_cast %78 : vector<1x8x8x1xf32> to vector<8x8x1xf32>
    %80 = vector.extract_strided_slice %31 {offsets = [5, 0, 0], sizes = [1, 8, 32], strides = [1, 1, 1]} : vector<8x8x32xf32> to vector<1x8x32xf32>
    %81 = vector.shape_cast %80 : vector<1x8x32xf32> to vector<8x32xf32>
    %82 = vector.shape_cast %81 : vector<8x32xf32> to vector<1x8x32xf32>
    %83 = vector.broadcast %79 : vector<8x8x1xf32> to vector<8x8x32xf32>
    %84 = vector.broadcast %82 : vector<1x8x32xf32> to vector<8x8x32xf32>
    %85 = arith.mulf %83, %84 : vector<8x8x32xf32>
    %86 = arith.addf %77, %85 : vector<8x8x32xf32>
    %87 = vector.extract_strided_slice %30 {offsets = [6, 0, 0, 0], sizes = [1, 8, 8, 1], strides = [1, 1, 1, 1]} : vector<8x8x8x1xf32> to vector<1x8x8x1xf32>
    %88 = vector.shape_cast %87 : vector<1x8x8x1xf32> to vector<8x8x1xf32>
    %89 = vector.extract_strided_slice %31 {offsets = [6, 0, 0], sizes = [1, 8, 32], strides = [1, 1, 1]} : vector<8x8x32xf32> to vector<1x8x32xf32>
    %90 = vector.shape_cast %89 : vector<1x8x32xf32> to vector<8x32xf32>
    %91 = vector.shape_cast %90 : vector<8x32xf32> to vector<1x8x32xf32>
    %92 = vector.broadcast %88 : vector<8x8x1xf32> to vector<8x8x32xf32>
    %93 = vector.broadcast %91 : vector<1x8x32xf32> to vector<8x8x32xf32>
    %94 = arith.mulf %92, %93 : vector<8x8x32xf32>
    %95 = arith.addf %86, %94 : vector<8x8x32xf32>
    %96 = vector.extract_strided_slice %30 {offsets = [7, 0, 0, 0], sizes = [1, 8, 8, 1], strides = [1, 1, 1, 1]} : vector<8x8x8x1xf32> to vector<1x8x8x1xf32>
    %97 = vector.shape_cast %96 : vector<1x8x8x1xf32> to vector<8x8x1xf32>
    %98 = vector.extract_strided_slice %31 {offsets = [7, 0, 0], sizes = [1, 8, 32], strides = [1, 1, 1]} : vector<8x8x32xf32> to vector<1x8x32xf32>
    %99 = vector.shape_cast %98 : vector<1x8x32xf32> to vector<8x32xf32>
    %100 = vector.shape_cast %99 : vector<8x32xf32> to vector<1x8x32xf32>
    %101 = vector.broadcast %97 : vector<8x8x1xf32> to vector<8x8x32xf32>
    %102 = vector.broadcast %100 : vector<1x8x32xf32> to vector<8x8x32xf32>
    %103 = arith.mulf %101, %102 : vector<8x8x32xf32>
    %104 = arith.addf %95, %103 : vector<8x8x32xf32>
    %105 = vector.shape_cast %104 : vector<8x8x32xf32> to vector<64x32xf32>
    %cst_17 = arith.constant dense<0.000000e+00> : vector<64x384xf32>
    %106 = tpu.matmul %105, %2, %cst_17 {dimension_numbers = #tpu.dot_dimension_numbers<[1], [0], [0], [1], [0, 0, 1, 1], [], []>} : vector<64x32xf32>, vector<32x384xf32>, vector<64x384xf32> -> vector<64x384xf32>
    %107 = vector.broadcast %4 : vector<1x384xf32> to vector<64x384xf32>
    %108 = arith.addf %106, %107 : vector<64x384xf32>
    %109 = vector.shape_cast %108 : vector<64x384xf32> to vector<8x8x384xf32>
    %110 = vector.extract_strided_slice %109 {offsets = [0, 0, 0], sizes = [1, 8, 384], strides = [1, 1, 1]} : vector<8x8x384xf32> to vector<1x8x384xf32>
    %111 = vector.shape_cast %110 : vector<1x8x384xf32> to vector<8x384xf32>
    %cst_18 = arith.constant dense<0.000000e+00> : vector<8x384xf32>
    %112 = tpu.matmul %6, %3, %cst_18 {dimension_numbers = #tpu.dot_dimension_numbers<[1], [0], [0], [1], [0, 0, 1, 1], [], []>} : vector<8x32xf32>, vector<32x384xf32>, vector<8x384xf32> -> vector<8x384xf32>
    %113 = vector.broadcast %5 : vector<1x384xf32> to vector<8x384xf32>
    %114 = arith.addf %112, %113 : vector<8x384xf32>
    %115 = vector.extract_strided_slice %111 {offsets = [0, 0], sizes = [8, 32], strides = [1, 1]} : vector<8x384xf32> to vector<8x32xf32>
    %116 = vector.extract_strided_slice %114 {offsets = [0, 0], sizes = [8, 32], strides = [1, 1]} : vector<8x384xf32> to vector<8x32xf32>
    %117 = arith.addf %115, %116 : vector<8x32xf32>
    %118 = arith.negf %117 : vector<8x32xf32>
    %119 = math.exp %118 : vector<8x32xf32>
    %cst_19 = arith.constant 1.000000e+00 : f32
    %120 = vector.broadcast %cst_19 : f32 to vector<8x32xf32>
    %121 = arith.addf %120, %119 : vector<8x32xf32>
    %122 = arith.divf %120, %121 : vector<8x32xf32>
    %123 = vector.extract_strided_slice %111 {offsets = [0, 128], sizes = [8, 32], strides = [1, 1]} : vector<8x384xf32> to vector<8x32xf32>
    %124 = vector.extract_strided_slice %114 {offsets = [0, 128], sizes = [8, 32], strides = [1, 1]} : vector<8x384xf32> to vector<8x32xf32>
    %125 = arith.addf %123, %124 : vector<8x32xf32>
    %126 = arith.negf %125 : vector<8x32xf32>
    %127 = math.exp %126 : vector<8x32xf32>
    %cst_20 = arith.constant 1.000000e+00 : f32
    %128 = vector.broadcast %cst_20 : f32 to vector<8x32xf32>
    %129 = arith.addf %128, %127 : vector<8x32xf32>
    %130 = arith.divf %128, %129 : vector<8x32xf32>
    %131 = vector.extract_strided_slice %111 {offsets = [0, 256], sizes = [8, 32], strides = [1, 1]} : vector<8x384xf32> to vector<8x32xf32>
    %132 = vector.extract_strided_slice %114 {offsets = [0, 256], sizes = [8, 32], strides = [1, 1]} : vector<8x384xf32> to vector<8x32xf32>
    %133 = arith.mulf %122, %132 : vector<8x32xf32>
    %134 = arith.addf %131, %133 : vector<8x32xf32>
    %135 = math.tanh %134 : vector<8x32xf32>
    %cst_21 = arith.constant 1.000000e+00 : f32
    %136 = vector.broadcast %cst_21 : f32 to vector<8x32xf32>
    %137 = arith.subf %136, %130 : vector<8x32xf32>
    %138 = arith.mulf %137, %135 : vector<8x32xf32>
    %139 = arith.mulf %130, %6 : vector<8x32xf32>
    %140 = arith.addf %138, %139 : vector<8x32xf32>
    %c0_22 = arith.constant 0 : index
    %c0_23 = arith.constant 0 : index
    %c0_24 = arith.constant 0 : index
    %141 = vector.load %arg4[%c0_22, %c0_23, %c0_24] : memref<8x8x32xf32, #tpu.memory_space<vmem>>, vector<1x8x32xf32>
    %142 = vector.shape_cast %141 : vector<1x8x32xf32> to vector<8x32xf32>
    %143 = vector.shape_cast %140 : vector<8x32xf32> to vector<1x8x32xf32>
    tpu.vector_store %arg4[%c0_22, %c0_23, %c0_24], %143 {strides = array<i32>} : memref<8x8x32xf32, #tpu.memory_space<vmem>>, vector<1x8x32xf32>,
    %144 = vector.extract_strided_slice %109 {offsets = [1, 0, 0], sizes = [1, 8, 384], strides = [1, 1, 1]} : vector<8x8x384xf32> to vector<1x8x384xf32>
    %145 = vector.shape_cast %144 : vector<1x8x384xf32> to vector<8x384xf32>
    %cst_25 = arith.constant dense<0.000000e+00> : vector<8x384xf32>
    %146 = tpu.matmul %140, %3, %cst_25 {dimension_numbers = #tpu.dot_dimension_numbers<[1], [0], [0], [1], [0, 0, 1, 1], [], []>} : vector<8x32xf32>, vector<32x384xf32>, vector<8x384xf32> -> vector<8x384xf32>
    %147 = vector.broadcast %5 : vector<1x384xf32> to vector<8x384xf32>
    %148 = arith.addf %146, %147 : vector<8x384xf32>
    %149 = vector.extract_strided_slice %145 {offsets = [0, 0], sizes = [8, 32], strides = [1, 1]} : vector<8x384xf32> to vector<8x32xf32>
    %150 = vector.extract_strided_slice %148 {offsets = [0, 0], sizes = [8, 32], strides = [1, 1]} : vector<8x384xf32> to vector<8x32xf32>
    %151 = arith.addf %149, %150 : vector<8x32xf32>
    %152 = arith.negf %151 : vector<8x32xf32>
    %153 = math.exp %152 : vector<8x32xf32>
    %cst_26 = arith.constant 1.000000e+00 : f32
    %154 = vector.broadcast %cst_26 : f32 to vector<8x32xf32>
    %155 = arith.addf %154, %153 : vector<8x32xf32>
    %156 = arith.divf %154, %155 : vector<8x32xf32>
    %157 = vector.extract_strided_slice %145 {offsets = [0, 128], sizes = [8, 32], strides = [1, 1]} : vector<8x384xf32> to vector<8x32xf32>
    %158 = vector.extract_strided_slice %148 {offsets = [0, 128], sizes = [8, 32], strides = [1, 1]} : vector<8x384xf32> to vector<8x32xf32>
    %159 = arith.addf %157, %158 : vector<8x32xf32>
    %160 = arith.negf %159 : vector<8x32xf32>
    %161 = math.exp %160 : vector<8x32xf32>
    %cst_27 = arith.constant 1.000000e+00 : f32
    %162 = vector.broadcast %cst_27 : f32 to vector<8x32xf32>
    %163 = arith.addf %162, %161 : vector<8x32xf32>
    %164 = arith.divf %162, %163 : vector<8x32xf32>
    %165 = vector.extract_strided_slice %145 {offsets = [0, 256], sizes = [8, 32], strides = [1, 1]} : vector<8x384xf32> to vector<8x32xf32>
    %166 = vector.extract_strided_slice %148 {offsets = [0, 256], sizes = [8, 32], strides = [1, 1]} : vector<8x384xf32> to vector<8x32xf32>
    %167 = arith.mulf %156, %166 : vector<8x32xf32>
    %168 = arith.addf %165, %167 : vector<8x32xf32>
    %169 = math.tanh %168 : vector<8x32xf32>
    %cst_28 = arith.constant 1.000000e+00 : f32
    %170 = vector.broadcast %cst_28 : f32 to vector<8x32xf32>
    %171 = arith.subf %170, %164 : vector<8x32xf32>
    %172 = arith.mulf %171, %169 : vector<8x32xf32>
    %173 = arith.mulf %164, %140 : vector<8x32xf32>
    %174 = arith.addf %172, %173 : vector<8x32xf32>
    %c1 = arith.constant 1 : index
    %c0_29 = arith.constant 0 : index
    %c0_30 = arith.constant 0 : index
    %175 = vector.load %arg4[%c1, %c0_29, %c0_30] : memref<8x8x32xf32, #tpu.memory_space<vmem>>, vector<1x8x32xf32>
    %176 = vector.shape_cast %175 : vector<1x8x32xf32> to vector<8x32xf32>
    %177 = vector.shape_cast %174 : vector<8x32xf32> to vector<1x8x32xf32>
    tpu.vector_store %arg4[%c1, %c0_29, %c0_30], %177 {strides = array<i32>} : memref<8x8x32xf32, #tpu.memory_space<vmem>>, vector<1x8x32xf32>,
    %178 = vector.extract_strided_slice %109 {offsets = [2, 0, 0], sizes = [1, 8, 384], strides = [1, 1, 1]} : vector<8x8x384xf32> to vector<1x8x384xf32>
    %179 = vector.shape_cast %178 : vector<1x8x384xf32> to vector<8x384xf32>
    %cst_31 = arith.constant dense<0.000000e+00> : vector<8x384xf32>
    %180 = tpu.matmul %174, %3, %cst_31 {dimension_numbers = #tpu.dot_dimension_numbers<[1], [0], [0], [1], [0, 0, 1, 1], [], []>} : vector<8x32xf32>, vector<32x384xf32>, vector<8x384xf32> -> vector<8x384xf32>
    %181 = vector.broadcast %5 : vector<1x384xf32> to vector<8x384xf32>
    %182 = arith.addf %180, %181 : vector<8x384xf32>
    %183 = vector.extract_strided_slice %179 {offsets = [0, 0], sizes = [8, 32], strides = [1, 1]} : vector<8x384xf32> to vector<8x32xf32>
    %184 = vector.extract_strided_slice %182 {offsets = [0, 0], sizes = [8, 32], strides = [1, 1]} : vector<8x384xf32> to vector<8x32xf32>
    %185 = arith.addf %183, %184 : vector<8x32xf32>
    %186 = arith.negf %185 : vector<8x32xf32>
    %187 = math.exp %186 : vector<8x32xf32>
    %cst_32 = arith.constant 1.000000e+00 : f32
    %188 = vector.broadcast %cst_32 : f32 to vector<8x32xf32>
    %189 = arith.addf %188, %187 : vector<8x32xf32>
    %190 = arith.divf %188, %189 : vector<8x32xf32>
    %191 = vector.extract_strided_slice %179 {offsets = [0, 128], sizes = [8, 32], strides = [1, 1]} : vector<8x384xf32> to vector<8x32xf32>
    %192 = vector.extract_strided_slice %182 {offsets = [0, 128], sizes = [8, 32], strides = [1, 1]} : vector<8x384xf32> to vector<8x32xf32>
    %193 = arith.addf %191, %192 : vector<8x32xf32>
    %194 = arith.negf %193 : vector<8x32xf32>
    %195 = math.exp %194 : vector<8x32xf32>
    %cst_33 = arith.constant 1.000000e+00 : f32
    %196 = vector.broadcast %cst_33 : f32 to vector<8x32xf32>
    %197 = arith.addf %196, %195 : vector<8x32xf32>
    %198 = arith.divf %196, %197 : vector<8x32xf32>
    %199 = vector.extract_strided_slice %179 {offsets = [0, 256], sizes = [8, 32], strides = [1, 1]} : vector<8x384xf32> to vector<8x32xf32>
    %200 = vector.extract_strided_slice %182 {offsets = [0, 256], sizes = [8, 32], strides = [1, 1]} : vector<8x384xf32> to vector<8x32xf32>
    %201 = arith.mulf %190, %200 : vector<8x32xf32>
    %202 = arith.addf %199, %201 : vector<8x32xf32>
    %203 = math.tanh %202 : vector<8x32xf32>
    %cst_34 = arith.constant 1.000000e+00 : f32
    %204 = vector.broadcast %cst_34 : f32 to vector<8x32xf32>
    %205 = arith.subf %204, %198 : vector<8x32xf32>
    %206 = arith.mulf %205, %203 : vector<8x32xf32>
    %207 = arith.mulf %198, %174 : vector<8x32xf32>
    %208 = arith.addf %206, %207 : vector<8x32xf32>
    %c2 = arith.constant 2 : index
    %c0_35 = arith.constant 0 : index
    %c0_36 = arith.constant 0 : index
    %209 = vector.load %arg4[%c2, %c0_35, %c0_36] : memref<8x8x32xf32, #tpu.memory_space<vmem>>, vector<1x8x32xf32>
    %210 = vector.shape_cast %209 : vector<1x8x32xf32> to vector<8x32xf32>
    %211 = vector.shape_cast %208 : vector<8x32xf32> to vector<1x8x32xf32>
    tpu.vector_store %arg4[%c2, %c0_35, %c0_36], %211 {strides = array<i32>} : memref<8x8x32xf32, #tpu.memory_space<vmem>>, vector<1x8x32xf32>,
    %212 = vector.extract_strided_slice %109 {offsets = [3, 0, 0], sizes = [1, 8, 384], strides = [1, 1, 1]} : vector<8x8x384xf32> to vector<1x8x384xf32>
    %213 = vector.shape_cast %212 : vector<1x8x384xf32> to vector<8x384xf32>
    %cst_37 = arith.constant dense<0.000000e+00> : vector<8x384xf32>
    %214 = tpu.matmul %208, %3, %cst_37 {dimension_numbers = #tpu.dot_dimension_numbers<[1], [0], [0], [1], [0, 0, 1, 1], [], []>} : vector<8x32xf32>, vector<32x384xf32>, vector<8x384xf32> -> vector<8x384xf32>
    %215 = vector.broadcast %5 : vector<1x384xf32> to vector<8x384xf32>
    %216 = arith.addf %214, %215 : vector<8x384xf32>
    %217 = vector.extract_strided_slice %213 {offsets = [0, 0], sizes = [8, 32], strides = [1, 1]} : vector<8x384xf32> to vector<8x32xf32>
    %218 = vector.extract_strided_slice %216 {offsets = [0, 0], sizes = [8, 32], strides = [1, 1]} : vector<8x384xf32> to vector<8x32xf32>
    %219 = arith.addf %217, %218 : vector<8x32xf32>
    %220 = arith.negf %219 : vector<8x32xf32>
    %221 = math.exp %220 : vector<8x32xf32>
    %cst_38 = arith.constant 1.000000e+00 : f32
    %222 = vector.broadcast %cst_38 : f32 to vector<8x32xf32>
    %223 = arith.addf %222, %221 : vector<8x32xf32>
    %224 = arith.divf %222, %223 : vector<8x32xf32>
    %225 = vector.extract_strided_slice %213 {offsets = [0, 128], sizes = [8, 32], strides = [1, 1]} : vector<8x384xf32> to vector<8x32xf32>
    %226 = vector.extract_strided_slice %216 {offsets = [0, 128], sizes = [8, 32], strides = [1, 1]} : vector<8x384xf32> to vector<8x32xf32>
    %227 = arith.addf %225, %226 : vector<8x32xf32>
    %228 = arith.negf %227 : vector<8x32xf32>
    %229 = math.exp %228 : vector<8x32xf32>
    %cst_39 = arith.constant 1.000000e+00 : f32
    %230 = vector.broadcast %cst_39 : f32 to vector<8x32xf32>
    %231 = arith.addf %230, %229 : vector<8x32xf32>
    %232 = arith.divf %230, %231 : vector<8x32xf32>
    %233 = vector.extract_strided_slice %213 {offsets = [0, 256], sizes = [8, 32], strides = [1, 1]} : vector<8x384xf32> to vector<8x32xf32>
    %234 = vector.extract_strided_slice %216 {offsets = [0, 256], sizes = [8, 32], strides = [1, 1]} : vector<8x384xf32> to vector<8x32xf32>
    %235 = arith.mulf %224, %234 : vector<8x32xf32>
    %236 = arith.addf %233, %235 : vector<8x32xf32>
    %237 = math.tanh %236 : vector<8x32xf32>
    %cst_40 = arith.constant 1.000000e+00 : f32
    %238 = vector.broadcast %cst_40 : f32 to vector<8x32xf32>
    %239 = arith.subf %238, %232 : vector<8x32xf32>
    %240 = arith.mulf %239, %237 : vector<8x32xf32>
    %241 = arith.mulf %232, %208 : vector<8x32xf32>
    %242 = arith.addf %240, %241 : vector<8x32xf32>
    %c3 = arith.constant 3 : index
    %c0_41 = arith.constant 0 : index
    %c0_42 = arith.constant 0 : index
    %243 = vector.load %arg4[%c3, %c0_41, %c0_42] : memref<8x8x32xf32, #tpu.memory_space<vmem>>, vector<1x8x32xf32>
    %244 = vector.shape_cast %243 : vector<1x8x32xf32> to vector<8x32xf32>
    %245 = vector.shape_cast %242 : vector<8x32xf32> to vector<1x8x32xf32>
    tpu.vector_store %arg4[%c3, %c0_41, %c0_42], %245 {strides = array<i32>} : memref<8x8x32xf32, #tpu.memory_space<vmem>>, vector<1x8x32xf32>,
    %246 = vector.extract_strided_slice %109 {offsets = [4, 0, 0], sizes = [1, 8, 384], strides = [1, 1, 1]} : vector<8x8x384xf32> to vector<1x8x384xf32>
    %247 = vector.shape_cast %246 : vector<1x8x384xf32> to vector<8x384xf32>
    %cst_43 = arith.constant dense<0.000000e+00> : vector<8x384xf32>
    %248 = tpu.matmul %242, %3, %cst_43 {dimension_numbers = #tpu.dot_dimension_numbers<[1], [0], [0], [1], [0, 0, 1, 1], [], []>} : vector<8x32xf32>, vector<32x384xf32>, vector<8x384xf32> -> vector<8x384xf32>
    %249 = vector.broadcast %5 : vector<1x384xf32> to vector<8x384xf32>
    %250 = arith.addf %248, %249 : vector<8x384xf32>
    %251 = vector.extract_strided_slice %247 {offsets = [0, 0], sizes = [8, 32], strides = [1, 1]} : vector<8x384xf32> to vector<8x32xf32>
    %252 = vector.extract_strided_slice %250 {offsets = [0, 0], sizes = [8, 32], strides = [1, 1]} : vector<8x384xf32> to vector<8x32xf32>
    %253 = arith.addf %251, %252 : vector<8x32xf32>
    %254 = arith.negf %253 : vector<8x32xf32>
    %255 = math.exp %254 : vector<8x32xf32>
    %cst_44 = arith.constant 1.000000e+00 : f32
    %256 = vector.broadcast %cst_44 : f32 to vector<8x32xf32>
    %257 = arith.addf %256, %255 : vector<8x32xf32>
    %258 = arith.divf %256, %257 : vector<8x32xf32>
    %259 = vector.extract_strided_slice %247 {offsets = [0, 128], sizes = [8, 32], strides = [1, 1]} : vector<8x384xf32> to vector<8x32xf32>
    %260 = vector.extract_strided_slice %250 {offsets = [0, 128], sizes = [8, 32], strides = [1, 1]} : vector<8x384xf32> to vector<8x32xf32>
    %261 = arith.addf %259, %260 : vector<8x32xf32>
    %262 = arith.negf %261 : vector<8x32xf32>
    %263 = math.exp %262 : vector<8x32xf32>
    %cst_45 = arith.constant 1.000000e+00 : f32
    %264 = vector.broadcast %cst_45 : f32 to vector<8x32xf32>
    %265 = arith.addf %264, %263 : vector<8x32xf32>
    %266 = arith.divf %264, %265 : vector<8x32xf32>
    %267 = vector.extract_strided_slice %247 {offsets = [0, 256], sizes = [8, 32], strides = [1, 1]} : vector<8x384xf32> to vector<8x32xf32>
    %268 = vector.extract_strided_slice %250 {offsets = [0, 256], sizes = [8, 32], strides = [1, 1]} : vector<8x384xf32> to vector<8x32xf32>
    %269 = arith.mulf %258, %268 : vector<8x32xf32>
    %270 = arith.addf %267, %269 : vector<8x32xf32>
    %271 = math.tanh %270 : vector<8x32xf32>
    %cst_46 = arith.constant 1.000000e+00 : f32
    %272 = vector.broadcast %cst_46 : f32 to vector<8x32xf32>
    %273 = arith.subf %272, %266 : vector<8x32xf32>
    %274 = arith.mulf %273, %271 : vector<8x32xf32>
    %275 = arith.mulf %266, %242 : vector<8x32xf32>
    %276 = arith.addf %274, %275 : vector<8x32xf32>
    %c4 = arith.constant 4 : index
    %c0_47 = arith.constant 0 : index
    %c0_48 = arith.constant 0 : index
    %277 = vector.load %arg4[%c4, %c0_47, %c0_48] : memref<8x8x32xf32, #tpu.memory_space<vmem>>, vector<1x8x32xf32>
    %278 = vector.shape_cast %277 : vector<1x8x32xf32> to vector<8x32xf32>
    %279 = vector.shape_cast %276 : vector<8x32xf32> to vector<1x8x32xf32>
    tpu.vector_store %arg4[%c4, %c0_47, %c0_48], %279 {strides = array<i32>} : memref<8x8x32xf32, #tpu.memory_space<vmem>>, vector<1x8x32xf32>,
    %280 = vector.extract_strided_slice %109 {offsets = [5, 0, 0], sizes = [1, 8, 384], strides = [1, 1, 1]} : vector<8x8x384xf32> to vector<1x8x384xf32>
    %281 = vector.shape_cast %280 : vector<1x8x384xf32> to vector<8x384xf32>
    %cst_49 = arith.constant dense<0.000000e+00> : vector<8x384xf32>
    %282 = tpu.matmul %276, %3, %cst_49 {dimension_numbers = #tpu.dot_dimension_numbers<[1], [0], [0], [1], [0, 0, 1, 1], [], []>} : vector<8x32xf32>, vector<32x384xf32>, vector<8x384xf32> -> vector<8x384xf32>
    %283 = vector.broadcast %5 : vector<1x384xf32> to vector<8x384xf32>
    %284 = arith.addf %282, %283 : vector<8x384xf32>
    %285 = vector.extract_strided_slice %281 {offsets = [0, 0], sizes = [8, 32], strides = [1, 1]} : vector<8x384xf32> to vector<8x32xf32>
    %286 = vector.extract_strided_slice %284 {offsets = [0, 0], sizes = [8, 32], strides = [1, 1]} : vector<8x384xf32> to vector<8x32xf32>
    %287 = arith.addf %285, %286 : vector<8x32xf32>
    %288 = arith.negf %287 : vector<8x32xf32>
    %289 = math.exp %288 : vector<8x32xf32>
    %cst_50 = arith.constant 1.000000e+00 : f32
    %290 = vector.broadcast %cst_50 : f32 to vector<8x32xf32>
    %291 = arith.addf %290, %289 : vector<8x32xf32>
    %292 = arith.divf %290, %291 : vector<8x32xf32>
    %293 = vector.extract_strided_slice %281 {offsets = [0, 128], sizes = [8, 32], strides = [1, 1]} : vector<8x384xf32> to vector<8x32xf32>
    %294 = vector.extract_strided_slice %284 {offsets = [0, 128], sizes = [8, 32], strides = [1, 1]} : vector<8x384xf32> to vector<8x32xf32>
    %295 = arith.addf %293, %294 : vector<8x32xf32>
    %296 = arith.negf %295 : vector<8x32xf32>
    %297 = math.exp %296 : vector<8x32xf32>
    %cst_51 = arith.constant 1.000000e+00 : f32
    %298 = vector.broadcast %cst_51 : f32 to vector<8x32xf32>
    %299 = arith.addf %298, %297 : vector<8x32xf32>
    %300 = arith.divf %298, %299 : vector<8x32xf32>
    %301 = vector.extract_strided_slice %281 {offsets = [0, 256], sizes = [8, 32], strides = [1, 1]} : vector<8x384xf32> to vector<8x32xf32>
    %302 = vector.extract_strided_slice %284 {offsets = [0, 256], sizes = [8, 32], strides = [1, 1]} : vector<8x384xf32> to vector<8x32xf32>
    %303 = arith.mulf %292, %302 : vector<8x32xf32>
    %304 = arith.addf %301, %303 : vector<8x32xf32>
    %305 = math.tanh %304 : vector<8x32xf32>
    %cst_52 = arith.constant 1.000000e+00 : f32
    %306 = vector.broadcast %cst_52 : f32 to vector<8x32xf32>
    %307 = arith.subf %306, %300 : vector<8x32xf32>
    %308 = arith.mulf %307, %305 : vector<8x32xf32>
    %309 = arith.mulf %300, %276 : vector<8x32xf32>
    %310 = arith.addf %308, %309 : vector<8x32xf32>
    %c5 = arith.constant 5 : index
    %c0_53 = arith.constant 0 : index
    %c0_54 = arith.constant 0 : index
    %311 = vector.load %arg4[%c5, %c0_53, %c0_54] : memref<8x8x32xf32, #tpu.memory_space<vmem>>, vector<1x8x32xf32>
    %312 = vector.shape_cast %311 : vector<1x8x32xf32> to vector<8x32xf32>
    %313 = vector.shape_cast %310 : vector<8x32xf32> to vector<1x8x32xf32>
    tpu.vector_store %arg4[%c5, %c0_53, %c0_54], %313 {strides = array<i32>} : memref<8x8x32xf32, #tpu.memory_space<vmem>>, vector<1x8x32xf32>,
    %314 = vector.extract_strided_slice %109 {offsets = [6, 0, 0], sizes = [1, 8, 384], strides = [1, 1, 1]} : vector<8x8x384xf32> to vector<1x8x384xf32>
    %315 = vector.shape_cast %314 : vector<1x8x384xf32> to vector<8x384xf32>
    %cst_55 = arith.constant dense<0.000000e+00> : vector<8x384xf32>
    %316 = tpu.matmul %310, %3, %cst_55 {dimension_numbers = #tpu.dot_dimension_numbers<[1], [0], [0], [1], [0, 0, 1, 1], [], []>} : vector<8x32xf32>, vector<32x384xf32>, vector<8x384xf32> -> vector<8x384xf32>
    %317 = vector.broadcast %5 : vector<1x384xf32> to vector<8x384xf32>
    %318 = arith.addf %316, %317 : vector<8x384xf32>
    %319 = vector.extract_strided_slice %315 {offsets = [0, 0], sizes = [8, 32], strides = [1, 1]} : vector<8x384xf32> to vector<8x32xf32>
    %320 = vector.extract_strided_slice %318 {offsets = [0, 0], sizes = [8, 32], strides = [1, 1]} : vector<8x384xf32> to vector<8x32xf32>
    %321 = arith.addf %319, %320 : vector<8x32xf32>
    %322 = arith.negf %321 : vector<8x32xf32>
    %323 = math.exp %322 : vector<8x32xf32>
    %cst_56 = arith.constant 1.000000e+00 : f32
    %324 = vector.broadcast %cst_56 : f32 to vector<8x32xf32>
    %325 = arith.addf %324, %323 : vector<8x32xf32>
    %326 = arith.divf %324, %325 : vector<8x32xf32>
    %327 = vector.extract_strided_slice %315 {offsets = [0, 128], sizes = [8, 32], strides = [1, 1]} : vector<8x384xf32> to vector<8x32xf32>
    %328 = vector.extract_strided_slice %318 {offsets = [0, 128], sizes = [8, 32], strides = [1, 1]} : vector<8x384xf32> to vector<8x32xf32>
    %329 = arith.addf %327, %328 : vector<8x32xf32>
    %330 = arith.negf %329 : vector<8x32xf32>
    %331 = math.exp %330 : vector<8x32xf32>
    %cst_57 = arith.constant 1.000000e+00 : f32
    %332 = vector.broadcast %cst_57 : f32 to vector<8x32xf32>
    %333 = arith.addf %332, %331 : vector<8x32xf32>
    %334 = arith.divf %332, %333 : vector<8x32xf32>
    %335 = vector.extract_strided_slice %315 {offsets = [0, 256], sizes = [8, 32], strides = [1, 1]} : vector<8x384xf32> to vector<8x32xf32>
    %336 = vector.extract_strided_slice %318 {offsets = [0, 256], sizes = [8, 32], strides = [1, 1]} : vector<8x384xf32> to vector<8x32xf32>
    %337 = arith.mulf %326, %336 : vector<8x32xf32>
    %338 = arith.addf %335, %337 : vector<8x32xf32>
    %339 = math.tanh %338 : vector<8x32xf32>
    %cst_58 = arith.constant 1.000000e+00 : f32
    %340 = vector.broadcast %cst_58 : f32 to vector<8x32xf32>
    %341 = arith.subf %340, %334 : vector<8x32xf32>
    %342 = arith.mulf %341, %339 : vector<8x32xf32>
    %343 = arith.mulf %334, %310 : vector<8x32xf32>
    %344 = arith.addf %342, %343 : vector<8x32xf32>
    %c6 = arith.constant 6 : index
    %c0_59 = arith.constant 0 : index
    %c0_60 = arith.constant 0 : index
    %345 = vector.load %arg4[%c6, %c0_59, %c0_60] : memref<8x8x32xf32, #tpu.memory_space<vmem>>, vector<1x8x32xf32>
    %346 = vector.shape_cast %345 : vector<1x8x32xf32> to vector<8x32xf32>
    %347 = vector.shape_cast %344 : vector<8x32xf32> to vector<1x8x32xf32>
    tpu.vector_store %arg4[%c6, %c0_59, %c0_60], %347 {strides = array<i32>} : memref<8x8x32xf32, #tpu.memory_space<vmem>>, vector<1x8x32xf32>,
    %348 = vector.extract_strided_slice %109 {offsets = [7, 0, 0], sizes = [1, 8, 384], strides = [1, 1, 1]} : vector<8x8x384xf32> to vector<1x8x384xf32>
    %349 = vector.shape_cast %348 : vector<1x8x384xf32> to vector<8x384xf32>
    %cst_61 = arith.constant dense<0.000000e+00> : vector<8x384xf32>
    %350 = tpu.matmul %344, %3, %cst_61 {dimension_numbers = #tpu.dot_dimension_numbers<[1], [0], [0], [1], [0, 0, 1, 1], [], []>} : vector<8x32xf32>, vector<32x384xf32>, vector<8x384xf32> -> vector<8x384xf32>
    %351 = vector.broadcast %5 : vector<1x384xf32> to vector<8x384xf32>
    %352 = arith.addf %350, %351 : vector<8x384xf32>
    %353 = vector.extract_strided_slice %349 {offsets = [0, 0], sizes = [8, 32], strides = [1, 1]} : vector<8x384xf32> to vector<8x32xf32>
    %354 = vector.extract_strided_slice %352 {offsets = [0, 0], sizes = [8, 32], strides = [1, 1]} : vector<8x384xf32> to vector<8x32xf32>
    %355 = arith.addf %353, %354 : vector<8x32xf32>
    %356 = arith.negf %355 : vector<8x32xf32>
    %357 = math.exp %356 : vector<8x32xf32>
    %cst_62 = arith.constant 1.000000e+00 : f32
    %358 = vector.broadcast %cst_62 : f32 to vector<8x32xf32>
    %359 = arith.addf %358, %357 : vector<8x32xf32>
    %360 = arith.divf %358, %359 : vector<8x32xf32>
    %361 = vector.extract_strided_slice %349 {offsets = [0, 128], sizes = [8, 32], strides = [1, 1]} : vector<8x384xf32> to vector<8x32xf32>
    %362 = vector.extract_strided_slice %352 {offsets = [0, 128], sizes = [8, 32], strides = [1, 1]} : vector<8x384xf32> to vector<8x32xf32>
    %363 = arith.addf %361, %362 : vector<8x32xf32>
    %364 = arith.negf %363 : vector<8x32xf32>
    %365 = math.exp %364 : vector<8x32xf32>
    %cst_63 = arith.constant 1.000000e+00 : f32
    %366 = vector.broadcast %cst_63 : f32 to vector<8x32xf32>
    %367 = arith.addf %366, %365 : vector<8x32xf32>
    %368 = arith.divf %366, %367 : vector<8x32xf32>
    %369 = vector.extract_strided_slice %349 {offsets = [0, 256], sizes = [8, 32], strides = [1, 1]} : vector<8x384xf32> to vector<8x32xf32>
    %370 = vector.extract_strided_slice %352 {offsets = [0, 256], sizes = [8, 32], strides = [1, 1]} : vector<8x384xf32> to vector<8x32xf32>
    %371 = arith.mulf %360, %370 : vector<8x32xf32>
    %372 = arith.addf %369, %371 : vector<8x32xf32>
    %373 = math.tanh %372 : vector<8x32xf32>
    %cst_64 = arith.constant 1.000000e+00 : f32
    %374 = vector.broadcast %cst_64 : f32 to vector<8x32xf32>
    %375 = arith.subf %374, %368 : vector<8x32xf32>
    %376 = arith.mulf %375, %373 : vector<8x32xf32>
    %377 = arith.mulf %368, %344 : vector<8x32xf32>
    %378 = arith.addf %376, %377 : vector<8x32xf32>
    %c7 = arith.constant 7 : index
    %c0_65 = arith.constant 0 : index
    %c0_66 = arith.constant 0 : index
    %379 = vector.load %arg4[%c7, %c0_65, %c0_66] : memref<8x8x32xf32, #tpu.memory_space<vmem>>, vector<1x8x32xf32>
    %380 = vector.shape_cast %379 : vector<1x8x32xf32> to vector<8x32xf32>
    %381 = vector.shape_cast %378 : vector<8x32xf32> to vector<1x8x32xf32>
    tpu.vector_store %arg4[%c7, %c0_65, %c0_66], %381 {strides = array<i32>} : memref<8x8x32xf32, #tpu.memory_space<vmem>>, vector<1x8x32xf32>,
    return
  }
}

</mosaic_0001>

<bundles_post_ra>
// kernel: tpu_custom_call.1
= control target key start
LH: loop header
LB: loop body
LE: loop exit
PB: predicated region body
PF: predicated region fallthrough
CT: control target
= control target key end

     0   :  { %s3725_s0 = inlined_call_operand.vmem [shape: f32[8,8,32], index: 0, kind: input, shape index: {}]   ;;  %s3726_s1 = inlined_call_operand.vmem [shape: f32[8,256], index: 1, kind: input, shape index: {}]   ;;  %s3727_s2 = inlined_call_operand.vmem [shape: f32[256,520], index: 2, kind: input, shape index: {}]   ;;  %s3728_s3 = inlined_call_operand.vmem [shape: f32[88,384], index: 3, kind: input, shape index: {}]   ;;  %s3729_s4 = inlined_call_operand.hbm [shape: f32[8,8,32], index: 4, kind: output, shape index: {}]  }
   0x1   :  { %v79_v0 = vld [vmem:[%s3727_s2 + $0x260] sm:$0xff]  ;;  %v75_v2 = vld [vmem:[%s3727_s2 + $0x238] sm:$0xff]  ;;  %v71_v4 = vld [vmem:[%s3727_s2 + $0x210] sm:$0xff] }
   0x2   :  { %v143_v1 = vld [vmem:[%s3727_s2 + $0x4e0] sm:$0xff]  ;;  %249 = vmatpush.msra.mxu2 %v79_v0  ;;  %v139_v3 = vld [vmem:[%s3727_s2 + $0x4b8] sm:$0xff]  ;;  %v135_v5 = vld [vmem:[%s3727_s2 + $0x490] sm:$0xff] }
   0x3   :  { %269 = vmatpush.msra.mxu3 %v143_v1  ;;  %v78_v6 = vld [vmem:[%s3727_s2 + $0x258] sm:$0xff]  ;;  %v67_v7 = vld [vmem:[%s3727_s2 + $0x1e8] sm:$0xff]  ;;  %v74_v10 = vld [vmem:[%s3727_s2 + $0x230] sm:$0xff] }
   0x4   :  { %250 = vmatpush.msra.mxu2 %v75_v2  ;;  %v142_v8 = vld [vmem:[%s3727_s2 + $0x4d8] sm:$0xff]  ;;  %v131_v9 = vld [vmem:[%s3727_s2 + $0x468] sm:$0xff]  ;;  %209 = vmatpush.msra.mxu0 %v78_v6  ;;  %v138_v11 = vld [vmem:[%s3727_s2 + $0x4b0] sm:$0xff] }
   0x5   :  { %270 = vmatpush.msra.mxu3 %v139_v3  ;;  %229 = vmatpush.msra.mxu1 %v142_v8  ;;  %v70_v12 = vld [vmem:[%s3727_s2 + $0x208] sm:$0xff]  ;;  %v63_v14 = vld [vmem:[%s3727_s2 + $0x1c0] sm:$0xff]  ;;  %v59_v18 = vld [vmem:[%s3727_s2 + $0x198] sm:$0xff] }
   0x6   :  { %251 = vmatpush.msra.mxu2 %v71_v4  ;;  %v134_v13 = vld [vmem:[%s3727_s2 + $0x488] sm:$0xff]  ;;  %v127_v15 = vld [vmem:[%s3727_s2 + $0x440] sm:$0xff]  ;;  %210 = vmatpush.msra.mxu0 %v74_v10  ;;  %v123_v19 = vld [vmem:[%s3727_s2 + $0x418] sm:$0xff] }
   0x7   :  { %271 = vmatpush.msra.mxu3 %v135_v5  ;;  %230 = vmatpush.msra.mxu1 %v138_v11  ;;  %v66_v16 = vld [vmem:[%s3727_s2 + $0x1e0] sm:$0xff]  ;;  %v62_v20 = vld [vmem:[%s3727_s2 + $0x1b8] sm:$0xff]  ;;  %v55_v22 = vld [vmem:[%s3727_s2 + $0x170] sm:$0xff] }
   0x8   :  { %252 = vmatpush.msra.mxu2 %v67_v7  ;;  %v130_v17 = vld [vmem:[%s3727_s2 + $0x460] sm:$0xff]  ;;  %211 = vmatpush.msra.mxu0 %v70_v12  ;;  %v126_v21 = vld [vmem:[%s3727_s2 + $0x438] sm:$0xff]  ;;  %v119_v23 = vld [vmem:[%s3727_s2 + $0x3f0] sm:$0xff] }
   0x9   :  { %272 = vmatpush.msra.mxu3 %v131_v9  ;;  %231 = vmatpush.msra.mxu1 %v134_v13  ;;  %v58_v24 = vld [vmem:[%s3727_s2 + $0x190] sm:$0xff]  ;;  %v51_v26 = vld [vmem:[%s3727_s2 + $0x148] sm:$0xff]  ;;  %v47_v30 = vld [vmem:[%s3727_s2 + $0x120] sm:$0xff] }
   0xa   :  { %253 = vmatpush.msra.mxu2 %v63_v14  ;;  %212 = vmatpush.msra.mxu0 %v66_v16  ;;  %v122_v25 = vld [vmem:[%s3727_s2 + $0x410] sm:$0xff]  ;;  %v115_v27 = vld [vmem:[%s3727_s2 + $0x3c8] sm:$0xff]  ;;  %v111_v31 = vld [vmem:[%s3727_s2 + $0x3a0] sm:$0xff] }
   0xb   :  { %273 = vmatpush.msra.mxu3 %v127_v15  ;;  %232 = vmatpush.msra.mxu1 %v130_v17  ;;  %v54_v28 = vld [vmem:[%s3727_s2 + $0x168] sm:$0xff]  ;;  %v50_v32 = vld [vmem:[%s3727_s2 + $0x140] sm:$0xff]  ;;  %v43_v34 = vld [vmem:[%s3727_s2 + $0xf8] sm:$0xff] }
   0xc   :  { %254 = vmatpush.msra.mxu2 %v59_v18  ;;  %213 = vmatpush.msra.mxu0 %v62_v20  ;;  %v118_v29 = vld [vmem:[%s3727_s2 + $0x3e8] sm:$0xff]  ;;  %v114_v33 = vld [vmem:[%s3727_s2 + $0x3c0] sm:$0xff]  ;;  %v107_v35 = vld [vmem:[%s3727_s2 + $0x378] sm:$0xff] }
   0xd   :  { %274 = vmatpush.msra.mxu3 %v123_v19  ;;  %233 = vmatpush.msra.mxu1 %v126_v21  ;;  %v46_v36 = vld [vmem:[%s3727_s2 + $0x118] sm:$0xff]  ;;  %v39_v38 = vld [vmem:[%s3727_s2 + $0xd0] sm:$0xff]  ;;  %v35_v42 = vld [vmem:[%s3727_s2 + $0xa8] sm:$0xff] }
   0xe   :  { %255 = vmatpush.msra.mxu2 %v55_v22  ;;  %214 = vmatpush.msra.mxu0 %v58_v24  ;;  %v110_v37 = vld [vmem:[%s3727_s2 + $0x398] sm:$0xff]  ;;  %v103_v39 = vld [vmem:[%s3727_s2 + $0x350] sm:$0xff]  ;;  %v99_v43 = vld [vmem:[%s3727_s2 + $0x328] sm:$0xff] }
   0xf   :  { %275 = vmatpush.msra.mxu3 %v119_v23  ;;  %234 = vmatpush.msra.mxu1 %v122_v25  ;;  %v42_v40 = vld [vmem:[%s3727_s2 + $0xf0] sm:$0xff]  ;;  %v38_v44 = vld [vmem:[%s3727_s2 + $0xc8] sm:$0xff]  ;;  %v31_v46 = vld [vmem:[%s3727_s2 + $0x80] sm:$0xff] }
  0x10   :  { %256 = vmatpush.msra.mxu2 %v51_v26  ;;  %215 = vmatpush.msra.mxu0 %v54_v28  ;;  %v106_v41 = vld [vmem:[%s3727_s2 + $0x370] sm:$0xff]  ;;  %v102_v45 = vld [vmem:[%s3727_s2 + $0x348] sm:$0xff]  ;;  %v95_v47 = vld [vmem:[%s3727_s2 + $0x300] sm:$0xff] }
  0x11   :  { %276 = vmatpush.msra.mxu3 %v115_v27  ;;  %235 = vmatpush.msra.mxu1 %v118_v29  ;;  %v34_v48 = vld [vmem:[%s3727_s2 + $0xa0] sm:$0xff]  ;;  %v27_v50 = vld [vmem:[%s3727_s2 + $0x58] sm:$0xff]  ;;  %v23_v54 = vld [vmem:[%s3727_s2 + $0x30] sm:$0xff] }
  0x12   :  { %257 = vmatpush.msra.mxu2 %v47_v30  ;;  %216 = vmatpush.msra.mxu0 %v50_v32  ;;  %v98_v49 = vld [vmem:[%s3727_s2 + $0x320] sm:$0xff]  ;;  %v91_v51 = vld [vmem:[%s3727_s2 + $0x2d8] sm:$0xff]  ;;  %v87_v55 = vld [vmem:[%s3727_s2 + $0x2b0] sm:$0xff] }
  0x13   :  { %277 = vmatpush.msra.mxu3 %v111_v31  ;;  %236 = vmatpush.msra.mxu1 %v114_v33  ;;  %v30_v52 = vld [vmem:[%s3727_s2 + $0x78] sm:$0xff]  ;;  %v26_v56 = vld [vmem:[%s3727_s2 + $0x50] sm:$0xff]  ;;  %v19_v58 = vld [vmem:[%s3727_s2 + $0x8] sm:$0xff] }
  0x14   :  { %258 = vmatpush.msra.mxu2 %v43_v34  ;;  %217 = vmatpush.msra.mxu0 %v46_v36  ;;  %v94_v53 = vld [vmem:[%s3727_s2 + $0x2f8] sm:$0xff]  ;;  %v90_v57 = vld [vmem:[%s3727_s2 + $0x2d0] sm:$0xff]  ;;  %v83_v59 = vld [vmem:[%s3727_s2 + $0x288] sm:$0xff] }
  0x15   :  { %278 = vmatpush.msra.mxu3 %v107_v35  ;;  %237 = vmatpush.msra.mxu1 %v110_v37  ;;  %v81_v60 = vld [vmem:[%s3727_s2 + $0x270] sm:$0xff]  ;;  %v22_v62 = vld [vmem:[%s3727_s2 + $0x28] sm:$0xff]  ;;  %v18_v2 = vld [vmem:[%s3727_s2] sm:$0xff] }
  0x16   :  { %259 = vmatpush.msra.mxu2 %v39_v38  ;;  %218 = vmatpush.msra.mxu0 %v42_v40  ;;  %v145_v61 = vld [vmem:[%s3727_s2 + $0x4f0] sm:$0xff]  ;;  %v86_v63 = vld [vmem:[%s3727_s2 + $0x2a8] sm:$0xff]  ;;  %v82_v3 = vld [vmem:[%s3727_s2 + $0x280] sm:$0xff] }
  0x17   :  { %279 = vmatpush.msra.mxu3 %v103_v39  ;;  %238 = vmatpush.msra.mxu1 %v106_v41  ;;  %v77_v0 = vld [vmem:[%s3727_s2 + $0x248] sm:$0xff]  ;;  %v73_v4 = vld [vmem:[%s3727_s2 + $0x220] sm:$0xff]  ;;  %v69_v8 = vld [vmem:[%s3727_s2 + $0x1f8] sm:$0xff] }
  0x18   :  { %260 = vmatpush.msra.mxu2 %v35_v42  ;;  %219 = vmatpush.msra.mxu0 %v38_v44  ;;  %v141_v1 = vld [vmem:[%s3727_s2 + $0x4c8] sm:$0xff]  ;;  %v137_v5 = vld [vmem:[%s3727_s2 + $0x4a0] sm:$0xff]  ;;  %v133_v9 = vld [vmem:[%s3727_s2 + $0x478] sm:$0xff] }
  0x19   :  { %280 = vmatpush.msra.mxu3 %v99_v43  ;;  %239 = vmatpush.msra.mxu1 %v102_v45  ;;  %v80_v6 = vld [vmem:[%s3727_s2 + $0x268] sm:$0xff]  ;;  %v76_v10 = vld [vmem:[%s3727_s2 + $0x240] sm:$0xff]  ;;  %v65_v12 = vld [vmem:[%s3727_s2 + $0x1d0] sm:$0xff] }
  0x1a   :  { %261 = vmatpush.msra.mxu2 %v31_v46  ;;  %220 = vmatpush.msra.mxu0 %v34_v48  ;;  %v144_v7 = vld [vmem:[%s3727_s2 + $0x4e8] sm:$0xff]  ;;  %v140_v11 = vld [vmem:[%s3727_s2 + $0x4c0] sm:$0xff]  ;;  %v129_v13 = vld [vmem:[%s3727_s2 + $0x450] sm:$0xff] }
  0x1b   :  { %281 = vmatpush.msra.mxu3 %v95_v47  ;;  %240 = vmatpush.msra.mxu1 %v98_v49  ;;  %v72_v14 = vld [vmem:[%s3727_s2 + $0x218] sm:$0xff]  ;;  %v61_v16 = vld [vmem:[%s3727_s2 + $0x1a8] sm:$0xff]  ;;  %v68_v18 = vld [vmem:[%s3727_s2 + $0x1f0] sm:$0xff] }
  0x1c   :  { %262 = vmatpush.msra.mxu2 %v27_v50  ;;  %221 = vmatpush.msra.mxu0 %v30_v52  ;;  %v136_v15 = vld [vmem:[%s3727_s2 + $0x498] sm:$0xff]  ;;  %v125_v17 = vld [vmem:[%s3727_s2 + $0x428] sm:$0xff]  ;;  %v132_v19 = vld [vmem:[%s3727_s2 + $0x470] sm:$0xff] }
  0x1d   :  { %282 = vmatpush.msra.mxu3 %v91_v51  ;;  %241 = vmatpush.msra.mxu1 %v94_v53  ;;  %v57_v20 = vld [vmem:[%s3727_s2 + $0x180] sm:$0xff]  ;;  %v64_v22 = vld [vmem:[%s3727_s2 + $0x1c8] sm:$0xff]  ;;  %v53_v24 = vld [vmem:[%s3727_s2 + $0x158] sm:$0xff] }
  0x1e   :  { %263 = vmatpush.msra.mxu2 %v23_v54  ;;  %222 = vmatpush.msra.mxu0 %v26_v56  ;;  %v121_v21 = vld [vmem:[%s3727_s2 + $0x400] sm:$0xff]  ;;  %v128_v23 = vld [vmem:[%s3727_s2 + $0x448] sm:$0xff]  ;;  %v117_v25 = vld [vmem:[%s3727_s2 + $0x3d8] sm:$0xff] }
  0x1f   :  { %283 = vmatpush.msra.mxu3 %v87_v55  ;;  %242 = vmatpush.msra.mxu1 %v90_v57  ;;  %v60_v26 = vld [vmem:[%s3727_s2 + $0x1a0] sm:$0xff]  ;;  %v49_v28 = vld [vmem:[%s3727_s2 + $0x130] sm:$0xff] }
  0x20   :  { %264 = vmatpush.msra.mxu2 %v19_v58  ;;  %223 = vmatpush.msra.mxu0 %v22_v62  ;;  %v124_v27 = vld [vmem:[%s3727_s2 + $0x420] sm:$0xff]  ;;  %v113_v29 = vld [vmem:[%s3727_s2 + $0x3b0] sm:$0xff] }
  0x21   :  { %284 = vmatpush.msra.mxu3 %v83_v59  ;;  %243 = vmatpush.msra.mxu1 %v86_v63 }
  0x22   :  { %329 = vmatpush.msrb.mxu2 %v81_v60  ;;  %224 = vmatpush.msra.mxu0 %v18_v2 }
  0x23   :  { %349 = vmatpush.msrb.mxu3 %v145_v61  ;;  %244 = vmatpush.msra.mxu1 %v82_v3 }
  0x24   :  { %330 = vmatpush.msrb.mxu2 %v77_v0  ;;  %289 = vmatpush.msrb.mxu0 %v80_v6 }
  0x25   :  { %350 = vmatpush.msrb.mxu3 %v141_v1  ;;  %309 = vmatpush.msrb.mxu1 %v144_v7 }
  0x26   :  { %331 = vmatpush.msrb.mxu2 %v73_v4  ;;  %290 = vmatpush.msrb.mxu0 %v76_v10 }
  0x27   :  { %351 = vmatpush.msrb.mxu3 %v137_v5  ;;  %310 = vmatpush.msrb.mxu1 %v140_v11 }
  0x28   :  { %332 = vmatpush.msrb.mxu2 %v69_v8  ;;  %291 = vmatpush.msrb.mxu0 %v72_v14 }
  0x29   :  { %352 = vmatpush.msrb.mxu3 %v133_v9  ;;  %311 = vmatpush.msrb.mxu1 %v136_v15 }
  0x2a   :  { %333 = vmatpush.msrb.mxu2 %v65_v12  ;;  %292 = vmatpush.msrb.mxu0 %v68_v18 }
  0x2b   :  { %353 = vmatpush.msrb.mxu3 %v129_v13  ;;  %312 = vmatpush.msrb.mxu1 %v132_v19 }
  0x2c   :  { %334 = vmatpush.msrb.mxu2 %v61_v16  ;;  %293 = vmatpush.msrb.mxu0 %v64_v22 }
  0x2d   :  { %354 = vmatpush.msrb.mxu3 %v125_v17  ;;  %313 = vmatpush.msrb.mxu1 %v128_v23 }
  0x2e   :  { %335 = vmatpush.msrb.mxu2 %v57_v20 }
  0x2f   :  { %355 = vmatpush.msrb.mxu3 %v121_v21 }
  0x30   :  { %9 = vsyncpa [#allocation3], 0  ;;  %336 = vmatpush.msrb.mxu2 %v53_v24  ;;  %v56_v30 = vld [vmem:[%s3727_s2 + $0x178] sm:$0xff]  ;;  %294 = vmatpush.msrb.mxu0 %v60_v26  ;;  %v45_v32 = vld [vmem:[%s3727_s2 + $0x108] sm:$0xff]  ;;  %vm372_vm0 = vcmask 1040384   ;;  %vm374_vm1 = vcmask 1041409  }
  0x31   :  { %356 = vmatpush.msrb.mxu3 %v117_v25  ;;  %v120_v31 = vld [vmem:[%s3727_s2 + $0x3f8] sm:$0xff]  ;;  %314 = vmatpush.msrb.mxu1 %v124_v27  ;;  %v109_v33 = vld [vmem:[%s3727_s2 + $0x388] sm:$0xff]  ;;  %v52_v34 = vld [vmem:[%s3727_s2 + $0x150] sm:$0xff]  ;;  %vm377_vm2 = vcmask 1042434   ;;  %vm380_vm3 = vcmask 1043459   ;;  %vm383_vm4 = vcmask 1044484  }
  0x32   :  { %337 = vmatpush.msrb.mxu2 %v49_v28  ;;  %v116_v35 = vld [vmem:[%s3727_s2 + $0x3d0] sm:$0xff]  ;;  %295 = vmatpush.msrb.mxu0 %v56_v30  ;;  %v41_v36 = vld [vmem:[%s3727_s2 + $0xe0] sm:$0xff]  ;;  %v2847_v39 = vld [vmem:[%s3726_s1 + $0x8] sm:$0xff]  ;;  %vm386_vm5 = vcmask 1045509   ;;  %vm389_vm6 = vcmask 1046534   ;;  %vm392_vm7 = vcmask 1046528  }
  0x33   :  { %357 = vmatpush.msrb.mxu3 %v113_v29  ;;  %315 = vmatpush.msrb.mxu1 %v120_v31  ;;  %v105_v37 = vld [vmem:[%s3727_s2 + $0x360] sm:$0xff]  ;;  %v37_v40 = vld [vmem:[%s3727_s2 + $0xb8] sm:$0xff]  ;;  %v48_v42 = vld [vmem:[%s3727_s2 + $0x128] sm:$0xff]  ;;  %vm541_vm8 = vcmask 64512   ;;  %vm1209_vm13 = vcmask 261120   ;;  %s2265_s10 = sshll.u32 %s3729_s4, 4  ;;  %s2266_s10 = int_to_ptr.hbm [resolvable:$true] %s2265_s10 }
  0x34   :  { %338 = vmatpush.msrb.mxu2 %v45_v32  ;;  %v2842_v38 = vld [vmem:[%s3726_s1] sm:$0xff]  ;;  %296 = vmatpush.msrb.mxu0 %v52_v34  ;;  %v101_v41 = vld [vmem:[%s3727_s2 + $0x338] sm:$0xff]  ;;  %v112_v43 = vld [vmem:[%s3727_s2 + $0x3a8] sm:$0xff]  ;;  %s2506_s11 = smov 128   ;;  %s2507_s12 = smov 8  }
  0x35   :  { %358 = vmatpush.msrb.mxu3 %v109_v33  ;;  %316 = vmatpush.msrb.mxu1 %v116_v35  ;;  %v33_v44 = vld [vmem:[%s3727_s2 + $0x90] sm:$0xff]  ;;  %v44_v46 = vld [vmem:[%s3727_s2 + $0x100] sm:$0xff]  ;;  %v29_v48 = vld [vmem:[%s3727_s2 + $0x68] sm:$0xff] }
  0x36   :  { %339 = vmatpush.msrb.mxu2 %v41_v36  ;;  %285 = vmatmul.f32.vlgmr.msra.gmra.mxu3 %v2847_v39  ;;  %v97_v45 = vld [vmem:[%s3727_s2 + $0x310] sm:$0xff]  ;;  %v108_v47 = vld [vmem:[%s3727_s2 + $0x380] sm:$0xff]  ;;  %v93_v49 = vld [vmem:[%s3727_s2 + $0x2e8] sm:$0xff] }
  0x37   :  { %359 = vmatpush.msrb.mxu3 %v105_v37  ;;  %265 = vmatmul.f32.vlgmr.msra.gmra.mxu2 %v2842_v38  ;;  %v40_v50 = vld [vmem:[%s3727_s2 + $0xd8] sm:$0xff]  ;;  %v25_v52 = vld [vmem:[%s3727_s2 + $0x40] sm:$0xff]  ;;  %v36_v54 = vld [vmem:[%s3727_s2 + $0xb0] sm:$0xff] }
  0x38   :  { %340 = vmatpush.msrb.mxu2 %v37_v40  ;;  %297 = vmatpush.msrb.mxu0 %v48_v42  ;;  %v104_v51 = vld [vmem:[%s3727_s2 + $0x358] sm:$0xff]  ;;  %v89_v53 = vld [vmem:[%s3727_s2 + $0x2c0] sm:$0xff]  ;;  %v100_v55 = vld [vmem:[%s3727_s2 + $0x330] sm:$0xff] }
  0x39   :  { %360 = vmatpush.msrb.mxu3 %v101_v41  ;;  %317 = vmatpush.msrb.mxu1 %v112_v43  ;;  %v21_v56 = vld [vmem:[%s3727_s2 + $0x18] sm:$0xff]  ;;  %v32_v58 = vld [vmem:[%s3727_s2 + $0x88] sm:$0xff]  ;;  %v28_v60 = vld [vmem:[%s3727_s2 + $0x60] sm:$0xff] }
  0x3a   :  { %341 = vmatpush.msrb.mxu2 %v33_v44  ;;  %298 = vmatpush.msrb.mxu0 %v44_v46  ;;  %v85_v57 = vld [vmem:[%s3727_s2 + $0x298] sm:$0xff]  ;;  %v96_v59 = vld [vmem:[%s3727_s2 + $0x308] sm:$0xff]  ;;  %v92_v61 = vld [vmem:[%s3727_s2 + $0x2e0] sm:$0xff] }
  0x3b   :  { %361 = vmatpush.msrb.mxu3 %v97_v45  ;;  %318 = vmatpush.msrb.mxu1 %v108_v47  ;;  %v24_v62 = vld [vmem:[%s3727_s2 + $0x38] sm:$0xff]  ;;  %v20_v0 = vld [vmem:[%s3727_s2 + $0x10] sm:$0xff]  ;;  %v159_v6 = vld [vmem:[%s3727_s2 + $0x228] sm:$0xff] }
  0x3c   :  { %342 = vmatpush.msrb.mxu2 %v29_v48  ;;  %299 = vmatpush.msrb.mxu0 %v40_v50  ;;  %v88_v63 = vld [vmem:[%s3727_s2 + $0x2b8] sm:$0xff]  ;;  %v84_v1 = vld [vmem:[%s3727_s2 + $0x290] sm:$0xff]  ;;  %v175_v7 = vld [vmem:[%s3727_s2 + $0x4a8] sm:$0xff] }
  0x3d   :  { %362 = vmatpush.msrb.mxu3 %v93_v49  ;;  %319 = vmatpush.msrb.mxu1 %v104_v51  ;;  %v161_v2 = vld [vmem:[%s3727_s2 + $0x278] sm:$0xff]  ;;  %v160_v4 = vld [vmem:[%s3727_s2 + $0x250] sm:$0xff]  ;;  %v158_v8 = vld [vmem:[%s3727_s2 + $0x200] sm:$0xff] }
  0x3e   :  { %343 = vmatpush.msrb.mxu2 %v25_v52  ;;  %300 = vmatpush.msrb.mxu0 %v36_v54  ;;  %v177_v3 = vld [vmem:[%s3727_s2 + $0x4f8] sm:$0xff]  ;;  %v176_v5 = vld [vmem:[%s3727_s2 + $0x4d0] sm:$0xff]  ;;  %v174_v9 = vld [vmem:[%s3727_s2 + $0x480] sm:$0xff] }
  0x3f   :  { %363 = vmatpush.msrb.mxu3 %v89_v53  ;;  %320 = vmatpush.msrb.mxu1 %v100_v55  ;;  %v157_v10 = vld [vmem:[%s3727_s2 + $0x1d8] sm:$0xff]  ;;  %v156_v12 = vld [vmem:[%s3727_s2 + $0x1b0] sm:$0xff]  ;;  %v155_v14 = vld [vmem:[%s3727_s2 + $0x188] sm:$0xff] }
  0x40   :  { %344 = vmatpush.msrb.mxu2 %v21_v56  ;;  %225 = vmatmul.f32.vlgmr.msra.gmra.mxu0 %v2842_v38  ;;  %v173_v11 = vld [vmem:[%s3727_s2 + $0x458] sm:$0xff]  ;;  %v172_v13 = vld [vmem:[%s3727_s2 + $0x430] sm:$0xff]  ;;  %v171_v15 = vld [vmem:[%s3727_s2 + $0x408] sm:$0xff] }
  0x41   :  { %364 = vmatpush.msrb.mxu3 %v85_v57  ;;  %245 = vmatmul.f32.vlgmr.msra.gmra.mxu1 %v2847_v39  ;;  %v154_v16 = vld [vmem:[%s3727_s2 + $0x160] sm:$0xff]  ;;  %v153_v18 = vld [vmem:[%s3727_s2 + $0x138] sm:$0xff]  ;;  %v152_v20 = vld [vmem:[%s3727_s2 + $0x110] sm:$0xff] }
  0x42   :  { %345 = vmatmul.f32.vlgmr.msrb.gmra.mxu2 %v2842_v38  ;;  %365 = vmatmul.f32.vlgmr.msrb.gmra.mxu3 %v2847_v39  ;;  %v170_v17 = vld [vmem:[%s3727_s2 + $0x3e0] sm:$0xff]  ;;  %v169_v19 = vld [vmem:[%s3727_s2 + $0x3b8] sm:$0xff]  ;;  %v168_v21 = vld [vmem:[%s3727_s2 + $0x390] sm:$0xff] }
  0x43   :  { %301 = vmatpush.msrb.mxu0 %v32_v58  ;;  %321 = vmatpush.msrb.mxu1 %v96_v59  ;;  %v151_v22 = vld [vmem:[%s3727_s2 + $0xe8] sm:$0xff]  ;;  %v150_v24 = vld [vmem:[%s3727_s2 + $0xc0] sm:$0xff]  ;;  %v149_v26 = vld [vmem:[%s3727_s2 + $0x98] sm:$0xff] }
  0x44   :  { %v167_v23 = vld [vmem:[%s3727_s2 + $0x368] sm:$0xff]  ;;  %v166_v25 = vld [vmem:[%s3727_s2 + $0x340] sm:$0xff]  ;;  %v165_v27 = vld [vmem:[%s3727_s2 + $0x318] sm:$0xff] }
  0x45   :  { %302 = vmatpush.msrb.mxu0 %v28_v60  ;;  %322 = vmatpush.msrb.mxu1 %v92_v61  ;;  %v148_v28 = vld [vmem:[%s3727_s2 + $0x70] sm:$0xff]  ;;  %v147_v30 = vld [vmem:[%s3727_s2 + $0x48] sm:$0xff]  ;;  %v146_v32 = vld [vmem:[%s3727_s2 + $0x20] sm:$0xff] }
  0x46   :  { %v164_v29 = vld [vmem:[%s3727_s2 + $0x2f0] sm:$0xff]  ;;  %v163_v31 = vld [vmem:[%s3727_s2 + $0x2c8] sm:$0xff]  ;;  %v162_v33 = vld [vmem:[%s3727_s2 + $0x2a0] sm:$0xff] }
  0x47   :  { %303 = vmatpush.msrb.mxu0 %v24_v62  ;;  %323 = vmatpush.msrb.mxu1 %v88_v63 }
  0x49   :  { %304 = vmatpush.msrb.mxu0 %v20_v0  ;;  %324 = vmatpush.msrb.mxu1 %v84_v1 }
  0x4a   :  { %305 = vmatmul.f32.vlgmr.msrb.gmra.mxu0 %v2842_v38  ;;  %325 = vmatmul.f32.vlgmr.msrb.gmra.mxu1 %v2847_v39 }
  0x4b   :  { %459 = vmatpush.msra.mxu0 %v161_v2  ;;  %500 = vmatpush.msra.mxu1 %v177_v3 }
  0x4d   :  { %460 = vmatpush.msra.mxu0 %v160_v4  ;;  %501 = vmatpush.msra.mxu1 %v176_v5 }
  0x4f   :  { %461 = vmatpush.msra.mxu0 %v159_v6  ;;  %502 = vmatpush.msra.mxu1 %v175_v7 }
  0x51   :  { %462 = vmatpush.msra.mxu0 %v158_v8  ;;  %503 = vmatpush.msra.mxu1 %v174_v9 }
  0x53   :  { %463 = vmatpush.msra.mxu0 %v157_v10  ;;  %504 = vmatpush.msra.mxu1 %v173_v11 }
  0x55   :  { %464 = vmatpush.msra.mxu0 %v156_v12  ;;  %505 = vmatpush.msra.mxu1 %v172_v13 }
  0x57   :  { %465 = vmatpush.msra.mxu0 %v155_v14  ;;  %506 = vmatpush.msra.mxu1 %v171_v15 }
  0x59   :  { %466 = vmatpush.msra.mxu0 %v154_v16  ;;  %507 = vmatpush.msra.mxu1 %v170_v17 }
  0x5b   :  { %467 = vmatpush.msra.mxu0 %v153_v18  ;;  %508 = vmatpush.msra.mxu1 %v169_v19 }
  0x5d   :  { %468 = vmatpush.msra.mxu0 %v152_v20  ;;  %509 = vmatpush.msra.mxu1 %v168_v21 }
  0x5f   :  { %469 = vmatpush.msra.mxu0 %v151_v22  ;;  %510 = vmatpush.msra.mxu1 %v167_v23 }
  0x61   :  { %470 = vmatpush.msra.mxu0 %v150_v24  ;;  %511 = vmatpush.msra.mxu1 %v166_v25 }
  0x63   :  { %471 = vmatpush.msra.mxu0 %v149_v26  ;;  %512 = vmatpush.msra.mxu1 %v165_v27 }
  0x65   :  { %472 = vmatpush.msra.mxu0 %v148_v28  ;;  %513 = vmatpush.msra.mxu1 %v164_v29 }
  0x67   :  { %473 = vmatpush.msra.mxu0 %v147_v30  ;;  %514 = vmatpush.msra.mxu1 %v163_v31 }
  0x69   :  { %474 = vmatpush.msra.mxu0 %v146_v32  ;;  %515 = vmatpush.msra.mxu1 %v162_v33 }
  0xb9   :  { %v286_v35 = vpop.f32.mrf.mxu3 }
  0xba   :  { %v266_v34 = vpop.f32.mrf.mxu2 }
  0xbb   :  { %v3035_v45 = vadd.f32 %v286_v35, %v266_v34 }
  0xbd   :  { %v226_v36 = vpop.f32.mrf.mxu0 }
  0xbe   :  { %v246_v37 = vpop.f32.mrf.mxu1 }
  0xbf   :  { %v3041_v48 = vadd.f32 %v246_v37, %v226_v36 }
  0xc5   :  { %v346_v38 = vpop.f32.mrf.mxu2  ;;  %v366_v39 = vpop.f32.mrf.mxu3 }
  0xc6   :  { %v367_v40 = vadd.f32 %v366_v39, %v346_v38 }
  0xc7   :  { %v306_v41 = vpop.f32.mrf.mxu0  ;;  %v326_v42 = vpop.f32.mrf.mxu1 }
  0xc8   :  { %v3031_v43 = vrot.slane %v367_v40, 7  ;;  %v3033_v44 = vadd.f32 %v326_v42, %v306_v41 }
  0xca   :  { %v373_v46 = vsel %vm372_vm0, %v3033_v44, %v3031_v43  ;;  %v375_v47 = vsel %vm374_vm1, %v3033_v44, %v3031_v43  ;;  %v378_v56 = vsel %vm377_vm2, %v3033_v44, %v3031_v43  ;;  %v381_v0 = vsel %vm380_vm3, %v3033_v44, %v3031_v43 }
  0xcb   :  { %v395_v49 = vperm.slane %v373_v46, 0  ;;  %v396_v50 = vperm.slane %v373_v46, 1  ;;  %v376_v51 = vrot.slane %v375_v47, 1  ;;  %v379_v58 = vrot.slane %v378_v56, 2 }
  0xcc   :  { %v382_v2 = vrot.slane %v381_v0, 3  ;;  %v384_v8 = vsel %vm383_vm4, %v3033_v44, %v3031_v43  ;;  %v387_v16 = vsel %vm386_vm5, %v3033_v44, %v3031_v43  ;;  %v390_v24 = vsel %vm389_vm6, %v3033_v44, %v3031_v43 }
  0xcd   :  { %v427_v52 = vadd.f32 %v395_v49, %v3041_v48  ;;  %v428_v53 = vadd.f32 %v396_v50, %v3035_v45  ;;  %v397_v54 = vperm.slane %v376_v51, 0  ;;  %v398_v55 = vperm.slane %v376_v51, 1 }
  0xce   :  { %v399_v62 = vperm.slane %v379_v58, 0  ;;  %v400_v63 = vperm.slane %v379_v58, 1  ;;  %v401_v6 = vperm.slane %v382_v2, 0  ;;  %v402_v7 = vperm.slane %v382_v2, 1 }
  0xcf   :  { %2349 = vtanh.f32 %v427_v52  ;;  %v429_v57 = vadd.f32 %v397_v54, %v3041_v48  ;;  %v430_v59 = vadd.f32 %v398_v55, %v3035_v45  ;;  %v385_v10 = vrot.slane %v384_v8, 4 }
  0xd0   :  { %2351 = vtanh.f32 %v428_v53  ;;  %v431_v1 = vadd.f32 %v399_v62, %v3041_v48  ;;  %v432_v3 = vadd.f32 %v400_v63, %v3035_v45  ;;  %v433_v9 = vadd.f32 %v401_v6, %v3041_v48 }
  0xd1   :  { %2353 = vtanh.f32 %v429_v57  ;;  %v434_v11 = vadd.f32 %v402_v7, %v3035_v45  ;;  %v403_v14 = vperm.slane %v385_v10, 0  ;;  %v404_v15 = vperm.slane %v385_v10, 1 }
  0xd2   :  { %2355 = vtanh.f32 %v430_v59  ;;  %v388_v18 = vrot.slane %v387_v16, 5  ;;  %v391_v26 = vrot.slane %v390_v24, 6  ;;  %v393_v32 = vsel %vm392_vm7, %v3031_v43, %v3033_v44 }
  0xd3   :  { %2357 = vtanh.f32 %v431_v1  ;;  %v435_v17 = vadd.f32 %v403_v14, %v3041_v48  ;;  %v436_v19 = vadd.f32 %v404_v15, %v3035_v45  ;;  %v394_v34 = vrot.slane %v393_v32, 7 }
  0xd4   :  { %2359 = vtanh.f32 %v432_v3  ;;  %v405_v22 = vperm.slane %v388_v18, 0  ;;  %v406_v23 = vperm.slane %v388_v18, 1  ;;  %v407_v30 = vperm.slane %v391_v26, 0 }
  0xd5   :  { %v2350_v60 = vpop.eup %2349  ;;  %2361 = vtanh.f32 %v433_v9  ;;  %v408_v31 = vperm.slane %v391_v26, 1  ;;  %v409_v38 = vperm.slane %v394_v34, 0  ;;  %v410_v39 = vperm.slane %v394_v34, 1 }
  0xd6   :  { %v2352_v61 = vpop.eup %2351  ;;  %475 = vmatmul.f32.vlgmr.msra.gmra.mxu0 %v2350_v60  ;;  %2363 = vtanh.f32 %v434_v11  ;;  %v437_v25 = vadd.f32 %v405_v22, %v3041_v48  ;;  %v438_v27 = vadd.f32 %v406_v23, %v3035_v45  ;;  %v439_v33 = vadd.f32 %v407_v30, %v3041_v48 }
  0xd7   :  { %516 = vmatmul.f32.vlgmr.msra.gmra.mxu1 %v2352_v61  ;;  %v2354_v4 = vpop.eup %2353  ;;  %2365 = vtanh.f32 %v435_v17  ;;  %v440_v35 = vadd.f32 %v408_v31, %v3035_v45  ;;  %v441_v40 = vadd.f32 %v409_v38, %v3041_v48  ;;  %v442_v41 = vadd.f32 %v410_v39, %v3035_v45 }
  0xd8   :  { %v2356_v5 = vpop.eup %2355  ;;  %2367 = vtanh.f32 %v436_v19 }
  0xd9   :  { %v2358_v12 = vpop.eup %2357  ;;  %2369 = vtanh.f32 %v437_v25 }
  0xda   :  { %v2360_v13 = vpop.eup %2359  ;;  %2371 = vtanh.f32 %v438_v27 }
  0xdb   :  { %v2362_v20 = vpop.eup %2361  ;;  %2373 = vtanh.f32 %v439_v33 }
  0xdc   :  { %v2364_v21 = vpop.eup %2363  ;;  %2375 = vtanh.f32 %v440_v35 }
  0xdd   :  { %v2366_v28 = vpop.eup %2365  ;;  %2377 = vtanh.f32 %v441_v40 }
  0xde   :  { %478 = vmatmul.f32.gmra.mxu0 %v2354_v4  ;;  %v2368_v29 = vpop.eup %2367  ;;  %2379 = vtanh.f32 %v442_v41 }
  0xdf   :  { %519 = vmatmul.f32.gmra.mxu1 %v2356_v5  ;;  %v2370_v36 = vpop.eup %2369 }
  0xe0   :  { %v2372_v37 = vpop.eup %2371 }
  0xe1   :  { %v2374_v42 = vpop.eup %2373 }
  0xe2   :  { %v2376_v46 = vpop.eup %2375 }
  0xe3   :  { %v2378_v43 = vpop.eup %2377 }
  0xe4   :  { %v2380_v44 = vpop.eup %2379 }
  0xe6   :  { %481 = vmatmul.f32.gmra.mxu0 %v2358_v12 }
  0xe7   :  { %522 = vmatmul.f32.gmra.mxu1 %v2360_v13 }
  0xee   :  { %484 = vmatmul.f32.gmra.mxu0 %v2362_v20 }
  0xef   :  { %525 = vmatmul.f32.gmra.mxu1 %v2364_v21 }
  0xf6   :  { %487 = vmatmul.f32.gmra.mxu0 %v2366_v28 }
  0xf7   :  { %528 = vmatmul.f32.gmra.mxu1 %v2368_v29 }
  0xfe   :  { %490 = vmatmul.f32.gmra.mxu0 %v2370_v36 }
  0xff   :  { %531 = vmatmul.f32.gmra.mxu1 %v2372_v37 }
 0x106   :  { %493 = vmatmul.f32.gmra.mxu0 %v2374_v42 }
 0x107   :  { %534 = vmatmul.f32.gmra.mxu1 %v2376_v46 }
 0x10e   :  { %496 = vmatmul.f32.gmra.mxu0 %v2378_v43  ;;  %v619_v43 = vlaneseq }
 0x10f   :  { %537 = vmatmul.f32.gmra.mxu1 %v2380_v44 }
 0x153   :  { %v476_v47 = vpop.f32.mrf.mxu0 }
 0x154   :  { %v517_v49 = vpop.f32.mrf.mxu1 }
 0x155   :  { %v518_v0 = vadd.f32 %v517_v49, %v476_v47 }
 0x157   :  { %v542_v11 = vsel %vm541_vm8, %v518_v0, -inf }
 0x15b   :  { %v479_v50 = vpop.f32.mrf.mxu0 }
 0x15c   :  { %v520_v51 = vpop.f32.mrf.mxu1 }
 0x15d   :  { %v521_v61 = vadd.f32 %v520_v51, %v479_v50  ;;  %v620_v50 = vshrl.u32 %v619_v43, 7 }
 0x15f   :  { %v543_v6 = vsel %vm541_vm8, %v521_v61, -inf  ;;  %2348 = vset.pattern.permute.xlu2 %v620_v50  ;;  %2347 = vset.pattern.permute.xlu1 %v620_v50 }
 0x160   :  { %2346 = vset.pattern.permute.xlu0 %v620_v50 }
 0x163   :  { %v482_v52 = vpop.f32.mrf.mxu0 }
 0x164   :  { %v523_v53 = vpop.f32.mrf.mxu1 }
 0x165   :  { %v524_v1 = vadd.f32 %v523_v53, %v482_v52 }
 0x167   :  { %v544_v12 = vsel %vm541_vm8, %v524_v1, -inf }
 0x16b   :  { %v485_v54 = vpop.f32.mrf.mxu0 }
 0x16c   :  { %v526_v48 = vpop.f32.mrf.mxu1 }
 0x16d   :  { %v527_v2 = vadd.f32 %v526_v48, %v485_v54 }
 0x16f   :  { %v545_v13 = vsel %vm541_vm8, %v527_v2, -inf }
 0x173   :  { %v488_v55 = vpop.f32.mrf.mxu0 }
 0x174   :  { %v529_v45 = vpop.f32.mrf.mxu1 }
 0x175   :  { %v530_v62 = vadd.f32 %v529_v45, %v488_v55 }
 0x177   :  { %v546_v7 = vsel %vm541_vm8, %v530_v62, -inf }
 0x178   :  { %v547_v15 = vmax.f32 %v542_v11, %v546_v7 }
 0x17b   :  { %v491_v56 = vpop.f32.mrf.mxu0 }
 0x17c   :  { %v532_v57 = vpop.f32.mrf.mxu1 }
 0x17d   :  { %v533_v60 = vadd.f32 %v532_v57, %v491_v56 }
 0x17f   :  { %v548_v3 = vsel %vm541_vm8, %v533_v60, -inf }
 0x180   :  { %v549_v10 = vmax.f32 %v543_v6, %v548_v3 }
 0x182   :  { %v554_v18 = vmax.f32 %v547_v15, %v549_v10 }
 0x183   :  { %v494_v58 = vpop.f32.mrf.mxu0 }
 0x184   :  { %v535_v59 = vpop.f32.mrf.mxu1 }
 0x185   :  { %v536_v63 = vadd.f32 %v535_v59, %v494_v58 }
 0x187   :  { %v550_v8 = vsel %vm541_vm8, %v536_v63, -inf }
 0x188   :  { %v551_v16 = vmax.f32 %v544_v12, %v550_v8 }
 0x18b   :  { %v497_v4 = vpop.f32.mrf.mxu0 }
 0x18c   :  { %v538_v5 = vpop.f32.mrf.mxu1 }
 0x18d   :  { %v539_v9 = vadd.f32 %v538_v5, %v497_v4 }
 0x18f   :  { %v552_v14 = vsel %vm541_vm8, %v539_v9, -inf }
 0x190   :  { %v553_v17 = vmax.f32 %v545_v13, %v552_v14 }
 0x192   :  { %v555_v19 = vmax.f32 %v551_v16, %v553_v17 }
 0x194   :  { %v556_v20 = vmax.f32 %v554_v18, %v555_v19 }
 0x196   :  { %v557_v21 = vsub.f32 %v518_v0, %v556_v20  ;;  %v558_v22 = vsub.f32 %v521_v61, %v556_v20  ;;  %v559_v23 = vsub.f32 %v524_v1, %v556_v20  ;;  %v560_v24 = vsub.f32 %v527_v2, %v556_v20 }
 0x197   :  { %v561_v25 = vsub.f32 %v530_v62, %v556_v20  ;;  %v562_v29 = vsub.f32 %v533_v60, %v556_v20  ;;  %v563_v31 = vsub.f32 %v536_v63, %v556_v20  ;;  %v564_v33 = vsub.f32 %v539_v9, %v556_v20 }
 0x198   :  { %v565_v26 = vmul.f32 1.442695, %v557_v21  ;;  %v567_v27 = vmul.f32 1.442695, %v558_v22  ;;  %v569_v28 = vmul.f32 1.442695, %v559_v23 }
 0x199   :  { %v571_v30 = vmul.f32 1.442695, %v560_v24  ;;  %v573_v32 = vmul.f32 1.442695, %v561_v25  ;;  %v575_v34 = vmul.f32 1.442695, %v562_v29 }
 0x19a   :  { %2381 = vpow2.f32 %v565_v26  ;;  %v577_v35 = vmul.f32 1.442695, %v563_v31  ;;  %v579_v38 = vmul.f32 1.442695, %v564_v33 }
 0x19b   :  { %2383 = vpow2.f32 %v567_v27 }
 0x19c   :  { %2385 = vpow2.f32 %v569_v28 }
 0x19d   :  { %2387 = vpow2.f32 %v571_v30 }
 0x19e   :  { %2389 = vpow2.f32 %v573_v32 }
 0x19f   :  { %2391 = vpow2.f32 %v575_v34 }
 0x1a0   :  { %v2382_v36 = vpop.eup %2381  ;;  %2393 = vpow2.f32 %v577_v35 }
 0x1a1   :  { %v2384_v37 = vpop.eup %2383  ;;  %v581_v39 = vsel %vm541_vm8, %v2382_v36, 0.0  ;;  %2395 = vpow2.f32 %v579_v38 }
 0x1a2   :  { %v2386_v40 = vpop.eup %2385  ;;  %v582_v41 = vsel %vm541_vm8, %v2384_v37, 0.0 }
 0x1a3   :  { %v2388_v42 = vpop.eup %2387  ;;  %v583_v46 = vadd.f32 %v582_v41, %v581_v39  ;;  %v584_v44 = vsel %vm541_vm8, %v2386_v40, 0.0 }
 0x1a4   :  { %v2390_v47 = vpop.eup %2389  ;;  %v586_v51 = vsel %vm541_vm8, %v2388_v42, 0.0 }
 0x1a5   :  { %v585_v49 = vadd.f32 %v584_v44, %v583_v46  ;;  %v2392_v52 = vpop.eup %2391  ;;  %v588_v54 = vsel %vm541_vm8, %v2390_v47, 0.0 }
 0x1a6   :  { %v2394_v48 = vpop.eup %2393  ;;  %v590_v45 = vsel %vm541_vm8, %v2392_v52, 0.0 }
 0x1a7   :  { %v587_v53 = vadd.f32 %v586_v51, %v585_v49  ;;  %v2396_v56 = vpop.eup %2395  ;;  %v592_v58 = vsel %vm541_vm8, %v2394_v48, 0.0 }
 0x1a8   :  { %v594_v60 = vsel %vm541_vm8, %v2396_v56, 0.0 }
 0x1a9   :  { %v589_v55 = vadd.f32 %v588_v54, %v587_v53 }
 0x1ab   :  { %v591_v57 = vadd.f32 %v590_v45, %v589_v55 }
 0x1ad   :  { %v593_v59 = vadd.f32 %v592_v58, %v591_v57 }
 0x1af   :  { %v595_v61 = vadd.f32 %v594_v60, %v593_v59  ;;  %v187_v60 = vld [vmem:[%s3728_s3 + $0x48] sm:$0xff] }
 0x1b0   :  { %1246 = vmatpush.msra.mxu2 %v187_v60 }
 0x1b1   :  { %2397 = vrcp.f32 %v595_v61  ;;  %v607_v1 = vand.u32 2147483648, %v595_v61  ;;  %v605_v3 = vand.u32 2147483647, %v595_v61  ;;  %vm601_vm10 = vweird.f32 %v595_v61 }
 0x1b3   :  { %v608_v5 = vor.u32 1.1754944e-38, %v607_v1  ;;  %vm606_vm12 = vcmp.eq.f32.partialorder %v605_v3, 8.507059e+37  ;;  %v185_v3 = vld [vmem:[%s3728_s3 + $0x38] sm:$0xff] }
 0x1b7   :  { %v2398_v62 = vpop.eup %2397 }
 0x1b8   :  { %v597_v63 = vmul.f32 %v2398_v62, %v595_v61  ;;  %vm602_vm9 = vweird.f32 %v2398_v62  ;;  %v188_v61 = vld [vmem:[%s3728_s3 + $0x50] sm:$0xff] }
 0x1b9   :  { %vm603_vm11 = vmor %vm601_vm10, %vm602_vm9  ;;  %1287 = vmatpush.msra.mxu3 %v188_v61 }
 0x1ba   :  { %v598_v0 = vsub.f32 1.0, %v597_v63 }
 0x1bb   :  { %1288 = vmatpush.msra.mxu3 %v185_v3 }
 0x1bc   :  { %v599_v2 = vmul.f32 %v2398_v62, %v598_v0 }
 0x1be   :  { %v600_v4 = vadd.f32 %v2398_v62, %v599_v2  ;;  %v184_v2 = vld [vmem:[%s3728_s3 + $0x30] sm:$0xff] }
 0x1bf   :  { %1247 = vmatpush.msra.mxu2 %v184_v2 }
 0x1c0   :  { %v604_v6 = vsel %vm603_vm11, %v2398_v62, %v600_v4  ;;  %v181_v4 = vld [vmem:[%s3728_s3 + $0x18] sm:$0xff] }
 0x1c1   :  { %v609_v7 = vsel %vm606_vm12, %v608_v5, %v604_v6  ;;  %v182_v5 = vld [vmem:[%s3728_s3 + $0x20] sm:$0xff]  ;;  %1248 = vmatpush.msra.mxu2 %v181_v4 }
 0x1c2   :  { %v3087_v8 = vmul.f32 %v2390_v47, %v609_v7  ;;  %v3089_v9 = vmul.f32 %v2386_v40, %v609_v7  ;;  %v3091_v10 = vmul.f32 %v2382_v36, %v609_v7  ;;  %v3096_v14 = vmul.f32 %v2388_v42, %v609_v7  ;;  %1289 = vmatpush.msra.mxu3 %v182_v5 }
 0x1c3   :  { %v3098_v15 = vmul.f32 %v2384_v37, %v609_v7  ;;  %v3103_v19 = vmul.f32 %v2392_v52, %v609_v7  ;;  %v3108_v23 = vmul.f32 %v2396_v56, %v609_v7  ;;  %v3110_v24 = vmul.f32 %v2394_v48, %v609_v7 }
 0x1c4   :  { %v842_v11 = vperm.slane %v3087_v8, 0  ;;  %v730_v12 = vperm.slane %v3089_v9, 0  ;;  %v618_v13 = vperm.slane %v3091_v10, 0  ;;  %v625_v16 = vperm.slane %v3091_v10, 1 }
 0x1c5   :  { %v786_v17 = vperm.slane %v3096_v14, 0  ;;  %v674_v18 = vperm.slane %v3098_v15, 0  ;;  %v737_v20 = vperm.slane %v3089_v9, 1  ;;  %v898_v21 = vperm.slane %v3103_v19, 0 }
 0x1c6   :  { %847 = vperm.xlu2 %2348, %v842_v11   ;;  %735 = vperm.xlu1 %2347, %v730_v12   ;;  %v681_v22 = vperm.slane %v3098_v15, 1  ;;  %v1010_v25 = vperm.slane %v3108_v23, 0  ;;  %v793_v26 = vperm.slane %v3096_v14, 1  ;;  %v954_v27 = vperm.slane %v3110_v24, 0  ;;  %v178_v12 = vld [vmem:[%s3728_s3] sm:$0xff] }
 0x1c7   :  { %623 = vperm.xlu0 %2346, %v618_v13   ;;  %v688_v28 = vperm.slane %v3098_v15, 2  ;;  %v632_v29 = vperm.slane %v3091_v10, 2  ;;  %v849_v30 = vperm.slane %v3087_v8, 1  ;;  %v961_v31 = vperm.slane %v3110_v24, 1  ;;  %v179_v13 = vld [vmem:[%s3728_s3 + $0x8] sm:$0xff]  ;;  %1249 = vmatpush.msra.mxu2 %v178_v12 }
 0x1c8   :  { %v744_v32 = vperm.slane %v3089_v9, 2  ;;  %v905_v33 = vperm.slane %v3103_v19, 1  ;;  %v856_v34 = vperm.slane %v3087_v8, 2  ;;  %v1017_v35 = vperm.slane %v3108_v23, 1  ;;  %1290 = vmatpush.msra.mxu3 %v179_v13 }
 0x1c9   :  { %v800_v36 = vperm.slane %v3096_v14, 2  ;;  %v912_v37 = vperm.slane %v3103_v19, 2  ;;  %v695_v38 = vperm.slane %v3098_v15, 3  ;;  %v639_v39 = vperm.slane %v3091_v10, 3 }
 0x1ca   :  { %v807_v40 = vperm.slane %v3096_v14, 3  ;;  %v968_v41 = vperm.slane %v3110_v24, 2  ;;  %v751_v42 = vperm.slane %v3089_v9, 3  ;;  %v646_v46 = vperm.slane %v3091_v10, 4 }
 0x1cb   :  { %v863_v43 = vperm.slane %v3087_v8, 3  ;;  %v1024_v44 = vperm.slane %v3108_v23, 2  ;;  %v758_v47 = vperm.slane %v3089_v9, 4  ;;  %v919_v49 = vperm.slane %v3103_v19, 3 }
 0x1cc   :  { %v702_v50 = vperm.slane %v3098_v15, 4  ;;  %v1031_v51 = vperm.slane %v3108_v23, 3  ;;  %v814_v52 = vperm.slane %v3096_v14, 4  ;;  %v975_v53 = vperm.slane %v3110_v24, 3 }
 0x1cd   :  { %v709_v48 = vperm.slane %v3098_v15, 5  ;;  %v653_v55 = vperm.slane %v3091_v10, 5  ;;  %v870_v45 = vperm.slane %v3087_v8, 4  ;;  %v982_v57 = vperm.slane %v3110_v24, 4 }
 0x1ce   :  { %630 = vperm.xlu2 %2348, %v625_v16   ;;  %791 = vperm.xlu1 %2347, %v786_v17   ;;  %v765_v58 = vperm.slane %v3089_v9, 5  ;;  %v926_v59 = vperm.slane %v3103_v19, 4  ;;  %v877_v63 = vperm.slane %v3087_v8, 5  ;;  %v1038_v0 = vperm.slane %v3108_v23, 4 }
 0x1cf   :  { %679 = vperm.xlu0 %2346, %v674_v18   ;;  %v821_v1 = vperm.slane %v3096_v14, 5  ;;  %v933_v16 = vperm.slane %v3103_v19, 5  ;;  %v716_v17 = vperm.slane %v3098_v15, 6  ;;  %v660_v18 = vperm.slane %v3091_v10, 6 }
 0x1d0   :  { %v940_v60 = vperm.slane %v3103_v19, 6  ;;  %v723_v61 = vperm.slane %v3098_v15, 7  ;;  %v1052_v4 = vperm.slane %v3108_v23, 6  ;;  %v835_v5 = vperm.slane %v3096_v14, 7 }
 0x1d6   :  { %742 = vperm.xlu2 %2348, %v737_v20   ;;  %903 = vperm.xlu1 %2347, %v898_v21   ;;  %v3184_v20 = vld [vmem:[%s3725_s0 + $0x8] sm:$0xff] }
 0x1d7   :  { %686 = vperm.xlu0 %2346, %v681_v22   ;;  %v3191_v22 = vld [vmem:[%s3725_s0] sm:$0xff] }
 0x1de   :  { %1015 = vperm.xlu2 %2348, %v1010_v25   ;;  %798 = vperm.xlu1 %2347, %v793_v26  }
 0x1df   :  { %959 = vperm.xlu0 %2346, %v954_v27  }
 0x1e6   :  { %693 = vperm.xlu2 %2348, %v688_v28   ;;  %637 = vperm.xlu1 %2347, %v632_v29   ;;  %v3198_v29 = vld [vmem:[%s3725_s0 + $0x10] sm:$0xff] }
 0x1e7   :  { %854 = vperm.xlu0 %2346, %v849_v30  }
 0x1ee   :  { %966 = vperm.xlu2 %2348, %v961_v31   ;;  %749 = vperm.xlu1 %2347, %v744_v32   ;;  %v828_v32 = vperm.slane %v3096_v14, 6 }
 0x1ef   :  { %910 = vperm.xlu0 %2346, %v905_v33   ;;  %v3205_v33 = vld [vmem:[%s3725_s0 + $0x18] sm:$0xff] }
 0x1f6   :  { %861 = vperm.xlu2 %2348, %v856_v34   ;;  %1022 = vperm.xlu1 %2347, %v1017_v35   ;;  %v989_v34 = vperm.slane %v3110_v24, 5  ;;  %v772_v35 = vperm.slane %v3089_v9, 6 }
 0x1f7   :  { %805 = vperm.xlu0 %2346, %v800_v36  }
 0x1fe   :  { %917 = vperm.xlu2 %2348, %v912_v37   ;;  %700 = vperm.xlu1 %2347, %v695_v38  }
 0x1ff   :  { %644 = vperm.xlu0 %2346, %v639_v39   ;;  %v3215_v39 = vld [vmem:[%s3725_s0 + $0x20] sm:$0xff] }
 0x206   :  { %812 = vperm.xlu2 %2348, %v807_v40   ;;  %973 = vperm.xlu1 %2347, %v968_v41  }
 0x207   :  { %756 = vperm.xlu0 %2346, %v751_v42  }
 0x20e   :  { %651 = vperm.xlu2 %2348, %v646_v46   ;;  %868 = vperm.xlu1 %2347, %v863_v43   ;;  %v3220_v46 = vld [vmem:[%s3725_s0 + $0x28] sm:$0xff] }
 0x20f   :  { %1029 = vperm.xlu0 %2346, %v1024_v44   ;;  %v667_v44 = vperm.slane %v3091_v10, 7  ;;  %v3238_v10 = vld [vmem:[%s3725_s0 + $0x30] sm:$0xff] }
 0x216   :  { %763 = vperm.xlu2 %2348, %v758_v47   ;;  %924 = vperm.xlu1 %2347, %v919_v49   ;;  %v884_v47 = vperm.slane %v3087_v8, 6  ;;  %v1045_v49 = vperm.slane %v3108_v23, 5 }
 0x217   :  { %707 = vperm.xlu0 %2346, %v702_v50  }
 0x21e   :  { %1036 = vperm.xlu2 %2348, %v1031_v51   ;;  %819 = vperm.xlu1 %2347, %v814_v52  }
 0x21f   :  { %980 = vperm.xlu0 %2346, %v975_v53   ;;  %v3233_v53 = vld [vmem:[%s3725_s0 + $0x38] sm:$0xff] }
 0x220   :  { %v3139_v54 = vpop.permute.xlu2 %847 }
 0x221   :  { %v1138_v43 = vmul.f32 %v3215_v39, %v3139_v54 }
 0x226   :  { %714 = vperm.xlu2 %2348, %v709_v48   ;;  %658 = vperm.xlu1 %2347, %v653_v55  }
 0x227   :  { %875 = vperm.xlu0 %2346, %v870_v45  }
 0x228   :  { %v3144_v56 = vpop.permute.xlu2 %630 }
 0x229   :  { %v1075_v15 = vmul.f32 %v3191_v22, %v3144_v56 }
 0x22e   :  { %987 = vperm.xlu2 %2348, %v982_v57   ;;  %770 = vperm.xlu1 %2347, %v765_v58  }
 0x22f   :  { %931 = vperm.xlu0 %2346, %v926_v59   ;;  %v779_v59 = vperm.slane %v3089_v9, 7 }
 0x230   :  { %v3155_v62 = vpop.permute.xlu2 %742 }
 0x236   :  { %882 = vperm.xlu2 %2348, %v877_v63   ;;  %1043 = vperm.xlu1 %2347, %v1038_v0  }
 0x237   :  { %826 = vperm.xlu0 %2346, %v821_v1  }
 0x238   :  { %v1016_v6 = vpop.permute.xlu2 %1015  ;;  %v736_v7 = vpop.permute.xlu1 %735 }
 0x239   :  { %v624_v11 = vpop.permute.xlu0 %623  ;;  %v1106_v30 = vmul.f32 %v3198_v29, %v736_v7  ;;  %v1186_v57 = vmul.f32 %v3233_v53, %v1016_v6  ;;  %v996_v6 = vperm.slane %v3110_v24, 6  ;;  %v1107_v7 = vmul.f32 %v3198_v29, %v3155_v62 }
 0x23a   :  { %v1074_v27 = vmul.f32 %v3191_v22, %v624_v11  ;;  %v891_v62 = vperm.slane %v3087_v8, 7 }
 0x23e   :  { %938 = vperm.xlu2 %2348, %v933_v16   ;;  %721 = vperm.xlu1 %2347, %v716_v17  }
 0x23f   :  { %665 = vperm.xlu0 %2346, %v660_v18  }
 0x240   :  { %v3186_v21 = vpop.permute.xlu2 %693  ;;  %v792_v25 = vpop.permute.xlu1 %791 }
 0x241   :  { %v680_v26 = vpop.permute.xlu0 %679  ;;  %v1122_v37 = vmul.f32 %v3205_v33, %v792_v25 }
 0x242   :  { %v1090_v28 = vmul.f32 %v3184_v20, %v680_v26  ;;  %v1003_v26 = vperm.slane %v3110_v24, 7  ;;  %v1059_v24 = vperm.slane %v3108_v23, 7 }
 0x244   :  { %v1098_v31 = vadd.f32 %v1090_v28, %v1074_v27  ;;  %v947_v27 = vperm.slane %v3103_v19, 7 }
 0x246   :  { %v1114_v36 = vadd.f32 %v1106_v30, %v1098_v31  ;;  %833 = vperm.xlu2 %2348, %v828_v32   ;;  %994 = vperm.xlu1 %2347, %v989_v34  }
 0x247   :  { %777 = vperm.xlu0 %2346, %v772_v35  }
 0x248   :  { %v3210_v38 = vpop.permute.xlu2 %966  ;;  %v904_v40 = vpop.permute.xlu1 %903  ;;  %v1130_v42 = vadd.f32 %v1122_v37, %v1114_v36 }
 0x249   :  { %v687_v41 = vpop.permute.xlu0 %686  ;;  %v1154_v51 = vmul.f32 %v3220_v46, %v904_v40  ;;  %v1171_v30 = vmul.f32 %v3238_v10, %v3210_v38  ;;  %v1092_v40 = vmul.f32 %v3184_v20, %v3186_v21 }
 0x24a   :  { %v1146_v50 = vadd.f32 %v1138_v43, %v1130_v42  ;;  %v1091_v0 = vmul.f32 %v3184_v20, %v687_v41 }
 0x24c   :  { %v1162_v55 = vadd.f32 %v1154_v51, %v1146_v50  ;;  %v1099_v3 = vadd.f32 %v1091_v0, %v1075_v15 }
 0x24e   :  { %672 = vperm.xlu2 %2348, %v667_v44   ;;  %889 = vperm.xlu1 %2347, %v884_v47   ;;  %v1115_v12 = vadd.f32 %v1107_v7, %v1099_v3 }
 0x24f   :  { %1050 = vperm.xlu0 %2346, %v1045_v49  }
 0x250   :  { %v3228_v52 = vpop.permute.xlu2 %861  ;;  %v799_v54 = vpop.permute.xlu1 %798 }
 0x251   :  { %v960_v48 = vpop.permute.xlu0 %959  ;;  %v1123_v11 = vmul.f32 %v3205_v33, %v799_v54  ;;  %v1140_v51 = vmul.f32 %v3215_v39, %v3228_v52 }
 0x252   :  { %v1170_v45 = vmul.f32 %v3238_v10, %v960_v48 }
 0x253   :  { %v1131_v17 = vadd.f32 %v1123_v11, %v1115_v12  ;;  %v3300_v12 = vld [vmem:[%s3728_s3 + $0xa8] sm:$0xff] }
 0x254   :  { %v1178_v58 = vadd.f32 %v1170_v45, %v1162_v55  ;;  %1379 = vmatpush.msrb.mxu3 %v3300_v12  ;;  %1490 = vmatpush.msrb.mxu0 %v3300_v12 }
 0x256   :  { %v3245_v63 = vadd.f32 %v1186_v57, %v1178_v58  ;;  %784 = vperm.xlu2 %2348, %v779_v59   ;;  %945 = vperm.xlu1 %2347, %v940_v60  }
 0x257   :  { %728 = vperm.xlu0 %2346, %v723_v61  }
 0x258   :  { %2279 = vmatmul.msk.f32.vlgmr.msra.gmra.mxu2 %vm1209_vm13, %v3245_v63  ;;  %2287 = vmatmul.msk.f32.vlgmr.msra.gmra.mxu3 %vm1209_vm13, %v3245_v63  ;;  %v918_v1 = vpop.permute.xlu2 %917  ;;  %v638_v9 = vpop.permute.xlu1 %637 }
 0x259   :  { %v855_v2 = vpop.permute.xlu0 %854  ;;  %v1076_v8 = vmul.f32 %v3191_v22, %v638_v9  ;;  %v1156_v48 = vmul.f32 %v3220_v46, %v918_v1 }
 0x25a   :  { %v1139_v13 = vmul.f32 %v3215_v39, %v855_v2 }
 0x25b   :  { %v1100_v42 = vadd.f32 %v1092_v40, %v1076_v8 }
 0x25c   :  { %v1147_v14 = vadd.f32 %v1139_v13, %v1131_v17 }
 0x25e   :  { %1057 = vperm.xlu2 %2348, %v1052_v4   ;;  %840 = vperm.xlu1 %2347, %v835_v5  }
 0x25f   :  { %1001 = vperm.xlu0 %2346, %v996_v6  }
 0x260   :  { %v750_v16 = vpop.permute.xlu1 %749  ;;  %v813_v18 = vpop.permute.xlu2 %812 }
 0x261   :  { %v911_v56 = vpop.permute.xlu0 %910  ;;  %v1108_v41 = vmul.f32 %v3198_v29, %v750_v16  ;;  %v1125_v5 = vmul.f32 %v3205_v33, %v813_v18 }
 0x262   :  { %v1155_v25 = vmul.f32 %v3220_v46, %v911_v56 }
 0x263   :  { %v1116_v23 = vadd.f32 %v1108_v41, %v1100_v42 }
 0x264   :  { %v1163_v28 = vadd.f32 %v1155_v25, %v1147_v14 }
 0x266   :  { %1008 = vperm.xlu2 %2348, %v1003_v26   ;;  %952 = vperm.xlu1 %2347, %v947_v27   ;;  %v1179_v34 = vadd.f32 %v1171_v30, %v1163_v28 }
 0x267   :  { %896 = vperm.xlu0 %2346, %v891_v62  }
 0x268   :  { %v1023_v31 = vpop.permute.xlu1 %1022  ;;  %v652_v37 = vpop.permute.xlu2 %651 }
 0x269   :  { %v806_v32 = vpop.permute.xlu0 %805  ;;  %v1187_v35 = vmul.f32 %v3233_v53, %v1023_v31  ;;  %v1078_v31 = vmul.f32 %v3191_v22, %v652_v37 }
 0x26a   :  { %v1124_v43 = vmul.f32 %v3205_v33, %v806_v32 }
 0x26b   :  { %v3268_v36 = vadd.f32 %v1187_v35, %v1179_v34  ;;  %v3317_v34 = vld [vmem:[%s3728_s3 + $0x90] sm:$0xff] }
 0x26c   :  { %v1132_v47 = vadd.f32 %v1124_v43, %v1116_v23  ;;  %1380 = vmatpush.msrb.mxu3 %v3317_v34  ;;  %1491 = vmatpush.msrb.mxu0 %v3317_v34 }
 0x26d   :  { %2280 = vmatmul.msk.f32.gmra.mxu2 %vm1209_vm13, %v3268_v36  ;;  %2288 = vmatmul.msk.f32.gmra.mxu3 %vm1209_vm13, %v3268_v36 }
 0x26e   :  { %v1148_v54 = vadd.f32 %v1140_v51, %v1132_v47 }
 0x26f   :  { %1064 = vperm.xlu0 %2346, %v1059_v24  }
 0x270   :  { %v701_v19 = vpop.permute.xlu1 %700  ;;  %v764_v44 = vpop.permute.xlu2 %763  ;;  %v1164_v45 = vadd.f32 %v1156_v48, %v1148_v54 }
 0x271   :  { %v645_v38 = vpop.permute.xlu0 %644  ;;  %v1093_v61 = vmul.f32 %v3184_v20, %v701_v19  ;;  %v1110_v35 = vmul.f32 %v3198_v29, %v764_v44 }
 0x272   :  { %v1077_v0 = vmul.f32 %v3191_v22, %v645_v38 }
 0x274   :  { %v1101_v1 = vadd.f32 %v1093_v61, %v1077_v0 }
 0x278   :  { %v974_v49 = vpop.permute.xlu1 %973  ;;  %v1037_v21 = vpop.permute.xlu2 %1036 }
 0x279   :  { %v757_v50 = vpop.permute.xlu0 %756  ;;  %v1172_v55 = vmul.f32 %v3238_v10, %v974_v49  ;;  %v1189_v25 = vmul.f32 %v3233_v53, %v1037_v21 }
 0x27a   :  { %v1109_v52 = vmul.f32 %v3198_v29, %v757_v50 }
 0x27b   :  { %v1180_v59 = vadd.f32 %v1172_v55, %v1164_v45  ;;  %v189_v55 = vld [vmem:[%s3728_s3 + $0x58] sm:$0xff] }
 0x27c   :  { %v1117_v3 = vadd.f32 %v1109_v52, %v1101_v1  ;;  %v3335_v45 = vld [vmem:[%s3728_s3 + $0x78] sm:$0xff]  ;;  %1328 = vmatpush.msrb.mxu2 %v189_v55 }
 0x27d   :  { %1381 = vmatpush.msrb.mxu3 %v3335_v45  ;;  %1492 = vmatpush.msrb.mxu0 %v3335_v45 }
 0x27e   :  { %v1133_v7 = vadd.f32 %v1125_v5, %v1117_v3 }
 0x280   :  { %v869_v57 = vpop.permute.xlu1 %868  ;;  %v715_v4 = vpop.permute.xlu2 %714 }
 0x281   :  { %v1030_v58 = vpop.permute.xlu0 %1029  ;;  %v1141_v6 = vmul.f32 %v3215_v39, %v869_v57 }
 0x282   :  { %v1188_v60 = vmul.f32 %v3233_v53, %v1030_v58 }
 0x283   :  { %v1149_v13 = vadd.f32 %v1141_v6, %v1133_v7 }
 0x284   :  { %v3287_v9 = vadd.f32 %v1188_v60, %v1180_v59  ;;  %v1095_v59 = vmul.f32 %v3184_v20, %v715_v4  ;;  %v186_v4 = vld [vmem:[%s3728_s3 + $0x40] sm:$0xff] }
 0x285   :  { %1329 = vmatpush.msrb.mxu2 %v186_v4 }
 0x286   :  { %2281 = vmatmul.msk.f32.gmra.mxu2 %vm1209_vm13, %v3287_v9  ;;  %2289 = vmatmul.msk.f32.gmra.mxu3 %vm1209_vm13, %v3287_v9 }
 0x288   :  { %v925_v2 = vpop.permute.xlu1 %924  ;;  %v988_v14 = vpop.permute.xlu2 %987 }
 0x289   :  { %v708_v15 = vpop.permute.xlu0 %707  ;;  %v1157_v11 = vmul.f32 %v3220_v46, %v925_v2  ;;  %v1174_v47 = vmul.f32 %v3238_v10, %v988_v14 }
 0x28a   :  { %v1094_v62 = vmul.f32 %v3184_v20, %v708_v15 }
 0x28b   :  { %v1165_v17 = vadd.f32 %v1157_v11, %v1149_v13 }
 0x28c   :  { %v1102_v32 = vadd.f32 %v1094_v62, %v1078_v31 }
 0x28e   :  { %v1118_v19 = vadd.f32 %v1110_v35, %v1102_v32  ;;  %v183_v32 = vld [vmem:[%s3728_s3 + $0x28] sm:$0xff]  ;;  %v180_v35 = vld [vmem:[%s3728_s3 + $0x10] sm:$0xff] }
 0x28f   :  { %1330 = vmatpush.msrb.mxu2 %v183_v32  ;;  %v2278_v32 = vld [vmem:[%s3728_s3 + $0xd8] ss:$8 sm:$0x7] }
 0x290   :  { %v820_v16 = vpop.permute.xlu1 %819  ;;  %v883_v8 = vpop.permute.xlu2 %882 }
 0x291   :  { %v981_v56 = vpop.permute.xlu0 %980  ;;  %v1126_v24 = vmul.f32 %v3205_v33, %v820_v16  ;;  %v1143_v5 = vmul.f32 %v3215_v39, %v883_v8  ;;  %v3356_v16 = vld [vmem:[%s3728_s3 + $0x60] sm:$0xff]  ;;  %1331 = vmatpush.msrb.mxu2 %v180_v35 }
 0x292   :  { %v1173_v18 = vmul.f32 %v3238_v10, %v981_v56  ;;  %1382 = vmatpush.msrb.mxu3 %v3356_v16  ;;  %1493 = vmatpush.msrb.mxu0 %v3356_v16 }
 0x293   :  { %v1134_v41 = vadd.f32 %v1126_v24, %v1118_v19 }
 0x294   :  { %v1181_v26 = vadd.f32 %v1173_v18, %v1165_v17  ;;  %1602 = vmatpush.msra.mxu0 %v3300_v12 }
 0x296   :  { %v3306_v27 = vadd.f32 %v1189_v25, %v1181_v26  ;;  %1603 = vmatpush.msra.mxu0 %v3317_v34 }
 0x298   :  { %2282 = vmatmul.msk.f32.gmra.mxu2 %vm1209_vm13, %v3306_v27  ;;  %2290 = vmatmul.msk.f32.gmra.mxu3 %vm1209_vm13, %v3306_v27  ;;  %v659_v28 = vpop.permute.xlu1 %658  ;;  %v939_v49 = vpop.permute.xlu2 %938 }
 0x299   :  { %v876_v30 = vpop.permute.xlu0 %875  ;;  %v1079_v21 = vmul.f32 %v3191_v22, %v659_v28  ;;  %v1159_v11 = vmul.f32 %v3220_v46, %v939_v49  ;;  %1604 = vmatpush.msra.mxu0 %v3335_v45 }
 0x29a   :  { %v1142_v38 = vmul.f32 %v3215_v39, %v876_v30 }
 0x29b   :  { %v1103_v0 = vadd.f32 %v1095_v59, %v1079_v21  ;;  %1605 = vmatpush.msra.mxu0 %v3356_v16  ;;  %v3396_v21 = vld [vmem:[%s3728_s3 + $0x98] sm:$0xff]  ;;  %v3409_v59 = vld [vmem:[%s3728_s3 + $0x68] sm:$0xff] }
 0x29c   :  { %v1150_v43 = vadd.f32 %v1142_v38, %v1134_v41 }
 0x2a0   :  { %v771_v40 = vpop.permute.xlu1 %770  ;;  %v834_v61 = vpop.permute.xlu2 %833 }
 0x2a1   :  { %v932_v37 = vpop.permute.xlu0 %931  ;;  %v1111_v60 = vmul.f32 %v3198_v29, %v771_v40  ;;  %v1128_v40 = vmul.f32 %v3205_v33, %v834_v61 }
 0x2a2   :  { %v1158_v42 = vmul.f32 %v3220_v46, %v932_v37 }
 0x2a3   :  { %v1119_v1 = vadd.f32 %v1111_v60, %v1103_v0 }
 0x2a4   :  { %v1166_v23 = vadd.f32 %v1158_v42, %v1150_v43  ;;  %v3386_v43 = vld [vmem:[%s3728_s3 + $0xb0] sm:$0xff] }
 0x2a5   :  { %1399 = vmatpush.msra.mxu3 %v3386_v43  ;;  %1510 = vmatpush.msrb.mxu1 %v3386_v43 }
 0x2a6   :  { %v1182_v54 = vadd.f32 %v1174_v47, %v1166_v23 }
 0x2a7   :  { %1400 = vmatpush.msra.mxu3 %v3396_v21  ;;  %1511 = vmatpush.msrb.mxu1 %v3396_v21 }
 0x2a8   :  { %v1044_v50 = vpop.permute.xlu1 %1043  ;;  %v673_v6 = vpop.permute.xlu2 %672 }
 0x2a9   :  { %v827_v51 = vpop.permute.xlu0 %826  ;;  %v1190_v44 = vmul.f32 %v3233_v53, %v1044_v50 }
 0x2aa   :  { %v1127_v52 = vmul.f32 %v3205_v33, %v827_v51 }
 0x2ab   :  { %v3327_v48 = vadd.f32 %v1190_v44, %v1182_v54  ;;  %v1081_v54 = vmul.f32 %v3191_v22, %v673_v6 }
 0x2ac   :  { %v1135_v2 = vadd.f32 %v1127_v52, %v1119_v1 }
 0x2ad   :  { %2283 = vmatmul.msk.f32.gmra.mxu2 %vm1209_vm13, %v3327_v48  ;;  %2291 = vmatmul.msk.f32.gmra.mxu3 %vm1209_vm13, %v3327_v48 }
 0x2ae   :  { %v1151_v7 = vadd.f32 %v1143_v5, %v1135_v2 }
 0x2b0   :  { %v722_v57 = vpop.permute.xlu1 %721  ;;  %v1167_v56 = vadd.f32 %v1159_v11, %v1151_v7  ;;  %v785_v30 = vpop.permute.xlu2 %784  ;;  %v3427_v7 = vld [vmem:[%s3728_s3 + $0xb8] sm:$0xff] }
 0x2b1   :  { %v666_v58 = vpop.permute.xlu0 %665  ;;  %v1096_v26 = vmul.f32 %v3184_v20, %v722_v57  ;;  %v3401_v57 = vld [vmem:[%s3728_s3 + $0x80] sm:$0xff]  ;;  %v1113_v60 = vmul.f32 %v3198_v29, %v785_v30  ;;  %2090 = vmatpush.msra.mxu2 %v3427_v7 }
 0x2b2   :  { %v1080_v62 = vmul.f32 %v3191_v22, %v666_v58  ;;  %1401 = vmatpush.msra.mxu3 %v3401_v57  ;;  %1512 = vmatpush.msrb.mxu1 %v3401_v57 }
 0x2b4   :  { %v1104_v24 = vadd.f32 %v1096_v26, %v1080_v62  ;;  %1402 = vmatpush.msra.mxu3 %v3409_v59  ;;  %1513 = vmatpush.msrb.mxu1 %v3409_v59 }
 0x2b6   :  { %1622 = vmatpush.msra.mxu1 %v3386_v43 }
 0x2b8   :  { %v995_v15 = vpop.permute.xlu1 %994  ;;  %v1058_v23 = vpop.permute.xlu2 %1057  ;;  %1623 = vmatpush.msra.mxu1 %v3396_v21 }
 0x2b9   :  { %v778_v3 = vpop.permute.xlu0 %777  ;;  %v1175_v13 = vmul.f32 %v3238_v10, %v995_v15 }
 0x2ba   :  { %v1112_v31 = vmul.f32 %v3198_v29, %v778_v3  ;;  %1624 = vmatpush.msra.mxu1 %v3401_v57 }
 0x2bb   :  { %v1183_v25 = vadd.f32 %v1175_v13, %v1167_v56  ;;  %v3438_v56 = vld [vmem:[%s3728_s3 + $0xa0] sm:$0xff] }
 0x2bc   :  { %v1120_v38 = vadd.f32 %v1112_v31, %v1104_v24  ;;  %1625 = vmatpush.msra.mxu1 %v3409_v59  ;;  %2091 = vmatpush.msra.mxu2 %v3438_v56  ;;  %v2277_v31 = vld [vmem:[%s3728_s3 + $0xc0] ss:$8 sm:$0x7] }
 0x2bd   :  { %v3518_v24 = vperm.slane %v2277_v31, 0 }
 0x2be   :  { %v1136_v41 = vadd.f32 %v1128_v40, %v1120_v38 }
 0x2c0   :  { %v890_v17 = vpop.permute.xlu1 %889  ;;  %v1009_v5 = vpop.permute.xlu2 %1008 }
 0x2c1   :  { %v1051_v18 = vpop.permute.xlu0 %1050  ;;  %v1144_v37 = vmul.f32 %v3215_v39, %v890_v17  ;;  %v3455_v17 = vld [vmem:[%s3728_s3 + $0xf0] sm:$0xff] }
 0x2c2   :  { %v1191_v14 = vmul.f32 %v3233_v53, %v1051_v18 }
 0x2c3   :  { %v1152_v47 = vadd.f32 %v1144_v37, %v1136_v41 }
 0x2c4   :  { %v3365_v28 = vadd.f32 %v1191_v14, %v1183_v25 }
 0x2c6   :  { %2284 = vmatmul.msk.f32.gmra.mxu2 %vm1209_vm13, %v3365_v28  ;;  %2292 = vmatmul.msk.f32.gmra.mxu3 %vm1209_vm13, %v3365_v28 }
 0x2c8   :  { %v946_v8 = vpop.permute.xlu1 %945 }
 0x2c9   :  { %v729_v19 = vpop.permute.xlu0 %728  ;;  %v1160_v42 = vmul.f32 %v3220_v46, %v946_v8  ;;  %v3520_v8 = vperm.slane %v2278_v32, 0 }
 0x2ca   :  { %v1097_v49 = vmul.f32 %v3184_v20, %v729_v19  ;;  %v1192_v20 = vmul.f32 %v3233_v53, %v1058_v23 }
 0x2cb   :  { %v1168_v44 = vadd.f32 %v1160_v42, %v1152_v47  ;;  %v3526_v42 = vperm.slane %v2277_v31, 1  ;;  %v3528_v47 = vperm.slane %v2278_v32, 1 }
 0x2cc   :  { %v1105_v22 = vadd.f32 %v1097_v49, %v1081_v54 }
 0x2ce   :  { %v1121_v52 = vadd.f32 %v1113_v60, %v1105_v22 }
 0x2d0   :  { %v841_v50 = vpop.permute.xlu1 %840 }
 0x2d1   :  { %v1002_v51 = vpop.permute.xlu0 %1001  ;;  %v1129_v61 = vmul.f32 %v3205_v33, %v841_v50 }
 0x2d2   :  { %v1176_v55 = vmul.f32 %v3238_v10, %v1002_v51 }
 0x2d3   :  { %v1137_v15 = vadd.f32 %v1129_v61, %v1121_v52 }
 0x2d4   :  { %v1184_v58 = vadd.f32 %v1176_v55, %v1168_v44 }
 0x2d6   :  { %v1200_v0 = vadd.f32 %v1192_v20, %v1184_v58 }
 0x2d8   :  { %2285 = vmatmul.msk.f32.gmra.mxu2 %vm1209_vm13, %v1200_v0  ;;  %2293 = vmatmul.msk.f32.gmra.mxu3 %vm1209_vm13, %v1200_v0  ;;  %v953_v1 = vpop.permute.xlu1 %952 }
 0x2d9   :  { %v897_v2 = vpop.permute.xlu0 %896  ;;  %v1161_v29 = vmul.f32 %v3220_v46, %v953_v1  ;;  %v3536_v1 = vperm.slane %v2278_v32, 2 }
 0x2da   :  { %v1145_v3 = vmul.f32 %v3215_v39, %v897_v2  ;;  %v1177_v39 = vmul.f32 %v3238_v10, %v1009_v5  ;;  %v3444_v10 = vld [vmem:[%s3728_s3 + $0x88] sm:$0xff]  ;;  %v3538_v5 = vperm.slane %v2277_v31, 2 }
 0x2db   :  { %2092 = vmatpush.msra.mxu2 %v3444_v10  ;;  %v1251_v25 = vpop.f32.mrf.mxu2 }
 0x2dc   :  { %v1153_v33 = vadd.f32 %v1145_v3, %v1137_v15  ;;  %v1252_v38 = vadd.f32 %v1251_v25, %v3518_v24 }
 0x2de   :  { %v1169_v6 = vadd.f32 %v1161_v29, %v1153_v33 }
 0x2e0   :  { %v1185_v13 = vadd.f32 %v1177_v39, %v1169_v6 }
 0x2e1   :  { %v1065_v11 = vpop.permute.xlu0 %1064 }
 0x2e2   :  { %v1193_v46 = vmul.f32 %v3233_v53, %v1065_v11  ;;  %v3450_v53 = vld [vmem:[%s3728_s3 + $0x70] sm:$0xff]  ;;  %s2505_s3 = smov [#allocation2]  }
 0x2e3   :  { %2093 = vmatpush.msra.mxu2 %v3450_v53  ;;  %s2263_s7 = sshll.u32 %s2505_s3, 4  ;;  %s2264_s7 = int_to_ptr.vmem [resolvable:$true] %s2263_s7 }
 0x2e4   :  { %v1201_v4 = vadd.f32 %v1193_v46, %v1185_v13 }
 0x2e6   :  { %2286 = vmatmul.msk.f32.gmra.mxu2 %vm1209_vm13, %v1201_v4  ;;  %2294 = vmatmul.msk.f32.gmra.mxu3 %vm1209_vm13, %v1201_v4 }
 0x2ee   :  { %2295 = vmatmul.msk.f32.vlgmr.msrb.gmra.mxu2 %vm1209_vm13, %v3245_v63  ;;  %2303 = vmatmul.msk.f32.vlgmr.msrb.gmra.mxu3 %vm1209_vm13, %v3455_v17  ;;  %v1292_v63 = vpop.f32.mrf.mxu3 }
 0x2ef   :  { %1419 = vmatpush.msrb.mxu3 %v3427_v7  ;;  %v1293_v50 = vadd.f32 %v1292_v63, %v3526_v42 }
 0x2f1   :  { %1420 = vmatpush.msrb.mxu3 %v3438_v56 }
 0x2f3   :  { %1421 = vmatpush.msrb.mxu3 %v3444_v10 }
 0x2f5   :  { %1422 = vmatpush.msrb.mxu3 %v3450_v53 }
 0x2f6   :  { %2296 = vmatmul.msk.f32.gmra.mxu2 %vm1209_vm13, %v3268_v36  ;;  %2304 = vmatmul.msk.f32.vlgmr.msra.gmra.mxu3 %vm1209_vm13, %v3455_v17  ;;  %v3490_v36 = vpop.f32.mrf.mxu3 }
 0x2f7   :  { %1530 = vmatpush.msra.mxu3 %v3427_v7 }
 0x2f9   :  { %1531 = vmatpush.msra.mxu3 %v3438_v56 }
 0x2fb   :  { %1532 = vmatpush.msra.mxu3 %v3444_v10 }
 0x2fd   :  { %1533 = vmatpush.msra.mxu3 %v3450_v53 }
 0x2fe   :  { %2297 = vmatmul.msk.f32.gmra.mxu2 %vm1209_vm13, %v3287_v9  ;;  %2305 = vmatmul.msk.f32.vlgmr.msrb.gmra.mxu3 %vm1209_vm13, %v3455_v17 }
 0x2ff   :  { %1642 = vmatpush.msrb.mxu3 %v3427_v7 }
 0x301   :  { %1643 = vmatpush.msrb.mxu3 %v3438_v56 }
 0x303   :  { %1644 = vmatpush.msrb.mxu3 %v3444_v10 }
 0x305   :  { %1645 = vmatpush.msrb.mxu3 %v3450_v53 }
 0x306   :  { %2298 = vmatmul.msk.f32.gmra.mxu2 %vm1209_vm13, %v3306_v27  ;;  %v3498_v27 = vpop.f32.mrf.mxu2 }
 0x309   :  { %v3492_v9 = vpop.f32.mrf.mxu3 }
 0x30e   :  { %2299 = vmatmul.msk.f32.gmra.mxu2 %vm1209_vm13, %v3327_v48  ;;  %v3502_v26 = vpop.f32.mrf.mxu2 }
 0x316   :  { %2300 = vmatmul.msk.f32.gmra.mxu2 %vm1209_vm13, %v3365_v28 }
 0x31b   :  { %v3494_v18 = vpop.f32.mrf.mxu3  ;;  %v3506_v28 = vpop.f32.mrf.mxu2 }
 0x31e   :  { %2301 = vmatmul.msk.f32.gmra.mxu2 %vm1209_vm13, %v1200_v0 }
 0x326   :  { %2302 = vmatmul.msk.f32.gmra.mxu2 %vm1209_vm13, %v1201_v4 }
 0x330   :  { %v3496_v14 = vpop.f32.mrf.mxu3  ;;  %v3516_v35 = vpop.f32.mrf.mxu2 }
 0x349   :  { %v3500_v48 = vpop.f32.mrf.mxu3  ;;  %v3524_v41 = vpop.f32.mrf.mxu2 }
 0x35b   :  { %v3504_v62 = vpop.f32.mrf.mxu3  ;;  %v3532_v44 = vpop.f32.mrf.mxu2 }
 0x369   :  { %v3508_v30 = vpop.f32.mrf.mxu3  ;;  %v3534_v58 = vpop.f32.mrf.mxu2 }
 0x371   :  { %v1384_v19 = vpop.f32.mrf.mxu3  ;;  %v1333_v13 = vpop.f32.mrf.mxu2 }
 0x372   :  { %v1385_v40 = vadd.f32 %v1384_v19, %v3520_v8  ;;  %v1334_v32 = vadd.f32 %v1333_v13, %v3538_v5 }
 0x374   :  { %v1427_v37 = vadd.f32 %v1385_v40, %v1252_v38 }
 0x376   :  { %v2306_v23 = vmul.f32 -1.442695, %v1427_v37 }
 0x378   :  { %2399 = vpow2.f32 %v2306_v23 }
 0x379   :  { %v1404_v49 = vpop.f32.mrf.mxu3 }
 0x37a   :  { %v1405_v51 = vadd.f32 %v1404_v49, %v3528_v47 }
 0x37c   :  { %v1447_v54 = vadd.f32 %v1405_v51, %v1293_v50 }
 0x37e   :  { %v2400_v55 = vpop.eup %2399  ;;  %v2307_v20 = vmul.f32 -1.442695, %v1447_v54 }
 0x37f   :  { %v1431_v22 = vadd.f32 1.0, %v2400_v55 }
 0x380   :  { %2401 = vpow2.f32 %v2307_v20 }
 0x381   :  { %2403 = vrcp.f32 %v1431_v22  ;;  %v1424_v15 = vpop.f32.mrf.mxu3  ;;  %v1443_v3 = vand.u32 2147483648, %v1431_v22  ;;  %v1441_v33 = vand.u32 2147483647, %v1431_v22  ;;  %vm1437_vm15 = vweird.f32 %v1431_v22 }
 0x382   :  { %v1425_v6 = vadd.f32 %v1424_v15, %v3536_v1 }
 0x383   :  { %v1444_v46 = vor.u32 1.1754944e-38, %v1443_v3  ;;  %vm1442_vm1 = vcmp.eq.f32.partialorder %v1441_v33, 8.507059e+37 }
 0x386   :  { %v2402_v60 = vpop.eup %2401 }
 0x387   :  { %v2404_v61 = vpop.eup %2403  ;;  %v1451_v0 = vadd.f32 1.0, %v2402_v60 }
 0x388   :  { %v1433_v52 = vmul.f32 %v2404_v61, %v1431_v22  ;;  %vm1438_vm14 = vweird.f32 %v2404_v61 }
 0x389   :  { %2405 = vrcp.f32 %v1451_v0  ;;  %vm1439_vm0 = vmor %vm1437_vm15, %vm1438_vm14  ;;  %v1463_v40 = vand.u32 2147483648, %v1451_v0  ;;  %v1461_v31 = vand.u32 2147483647, %v1451_v0  ;;  %vm1457_vm3 = vweird.f32 %v1451_v0 }
 0x38a   :  { %v1434_v2 = vsub.f32 1.0, %v1433_v52  ;;  %v1255_v52 = vadd.f32 %v3498_v27, %v3518_v24 }
 0x38b   :  { %v1464_v50 = vor.u32 1.1754944e-38, %v1463_v40  ;;  %vm1462_vm5 = vcmp.eq.f32.partialorder %v1461_v31, 8.507059e+37 }
 0x38c   :  { %v1435_v29 = vmul.f32 %v2404_v61, %v1434_v2  ;;  %v1296_v2 = vadd.f32 %v3490_v36, %v3526_v42 }
 0x38e   :  { %v1436_v39 = vadd.f32 %v2404_v61, %v1435_v29 }
 0x38f   :  { %v2406_v11 = vpop.eup %2405 }
 0x390   :  { %v1453_v4 = vmul.f32 %v2406_v11, %v1451_v0  ;;  %v1440_v63 = vsel %vm1439_vm0, %v2404_v61, %v1436_v39  ;;  %vm1458_vm2 = vweird.f32 %v2406_v11 }
 0x391   :  { %v1445_v25 = vsel %vm1442_vm1, %v1444_v46, %v1440_v63  ;;  %vm1459_vm4 = vmor %vm1457_vm3, %vm1458_vm2 }
 0x392   :  { %v1454_v19 = vsub.f32 1.0, %v1453_v4  ;;  %v1467_v38 = vmul.f32 %v1445_v25, %v1425_v6 }
 0x394   :  { %v1455_v37 = vmul.f32 %v2406_v11, %v1454_v19  ;;  %v1468_v23 = vadd.f32 %v1467_v38, %v1334_v32 }
 0x396   :  { %v1456_v49 = vadd.f32 %v2406_v11, %v1455_v37  ;;  %2407 = vtanh.f32 %v1468_v23 }
 0x398   :  { %v1460_v51 = vsel %vm1459_vm4, %v2406_v11, %v1456_v49 }
 0x399   :  { %v1465_v54 = vsel %vm1462_vm5, %v1464_v50, %v1460_v51  ;;  %v1336_v50 = vpop.f32.mrf.mxu2 }
 0x39a   :  { %v1470_v55 = vsub.f32 1.0, %v1465_v54  ;;  %v1472_v60 = vmul.f32 %v1465_v54, %v3455_v17 }
 0x39c   :  { %v2408_v20 = vpop.eup %2407 }
 0x39d   :  { %v1471_v22 = vmul.f32 %v2408_v20, %v1470_v55 }
 0x39f   :  { %v3543_v61 = vadd.f32 %v1472_v60, %v1471_v22  ;;  %v1337_v60 = vadd.f32 %v1336_v50, %v3538_v5 }
 0x3a1   :  { %1474 = vst.msk [vmem:[#allocation2] sm:$0xff] %vm1209_vm13, %v3543_v61  ;;  %2308 = vmatmul.msk.f32.vlgmr.msrb.gmra.mxu0 %vm1209_vm13, %v3543_v61  ;;  %2309 = vmatmul.msk.f32.vlgmr.msrb.gmra.mxu1 %vm1209_vm13, %v3543_v61 }
 0x3a2   :  { %2310 = vmatmul.msk.f32.vlgmr.msra.gmra.mxu3 %vm1209_vm13, %v3543_v61  ;;  %1714 = vmatpush.msrb.mxu0 %v3300_v12 }
 0x3a3   :  { %1734 = vmatpush.msrb.mxu1 %v3386_v43  ;;  %1754 = vmatpush.msra.mxu3 %v3427_v7 }
 0x3a4   :  { %1715 = vmatpush.msrb.mxu0 %v3317_v34 }
 0x3a5   :  { %1735 = vmatpush.msrb.mxu1 %v3396_v21  ;;  %1755 = vmatpush.msra.mxu3 %v3438_v56 }
 0x3a6   :  { %1716 = vmatpush.msrb.mxu0 %v3335_v45 }
 0x3a7   :  { %1736 = vmatpush.msrb.mxu1 %v3401_v57  ;;  %1756 = vmatpush.msra.mxu3 %v3444_v10 }
 0x3a8   :  { %1717 = vmatpush.msrb.mxu0 %v3356_v16 }
 0x3a9   :  { %1737 = vmatpush.msrb.mxu1 %v3409_v59  ;;  %1757 = vmatpush.msra.mxu3 %v3450_v53 }
 0x41e   :  { %v1495_v17 = vpop.f32.mrf.mxu0  ;;  %v1515_v0 = vpop.f32.mrf.mxu1 }
 0x41f   :  { %v1496_v15 = vadd.f32 %v1495_v17, %v3520_v8  ;;  %v1516_v3 = vadd.f32 %v1515_v0, %v3528_v47 }
 0x421   :  { %v1538_v29 = vadd.f32 %v1496_v15, %v1255_v52  ;;  %v1558_v33 = vadd.f32 %v1516_v3, %v1296_v2 }
 0x423   :  { %v2311_v6 = vmul.f32 -1.442695, %v1538_v29  ;;  %v2312_v39 = vmul.f32 -1.442695, %v1558_v33 }
 0x425   :  { %2409 = vpow2.f32 %v2311_v6  ;;  %v1535_v23 = vpop.f32.mrf.mxu3 }
 0x426   :  { %2411 = vpow2.f32 %v2312_v39  ;;  %v1536_v54 = vadd.f32 %v1535_v23, %v3536_v1 }
 0x42b   :  { %v2410_v11 = vpop.eup %2409 }
 0x42c   :  { %v2412_v13 = vpop.eup %2411  ;;  %v1542_v46 = vadd.f32 1.0, %v2410_v11 }
 0x42d   :  { %v1562_v4 = vadd.f32 1.0, %v2412_v13 }
 0x42e   :  { %2413 = vrcp.f32 %v1542_v46  ;;  %v1554_v38 = vand.u32 2147483648, %v1542_v46  ;;  %v1552_v37 = vand.u32 2147483647, %v1542_v46  ;;  %vm1548_vm7 = vweird.f32 %v1542_v46 }
 0x42f   :  { %2415 = vrcp.f32 %v1562_v4  ;;  %v1574_v17 = vand.u32 2147483648, %v1562_v4  ;;  %vm1568_vm11 = vweird.f32 %v1562_v4  ;;  %v1572_v52 = vand.u32 2147483647, %v1562_v4 }
 0x430   :  { %v1555_v51 = vor.u32 1.1754944e-38, %v1554_v38  ;;  %vm1553_vm9 = vcmp.eq.f32.partialorder %v1552_v37, 8.507059e+37 }
 0x431   :  { %v1575_v3 = vor.u32 1.1754944e-38, %v1574_v17  ;;  %vm1573_vm14 = vcmp.eq.f32.partialorder %v1572_v52, 8.507059e+37  ;;  %v1339_v52 = vpop.f32.mrf.mxu2 }
 0x434   :  { %v2414_v27 = vpop.eup %2413 }
 0x435   :  { %v2416_v63 = vpop.eup %2415  ;;  %v1544_v25 = vmul.f32 %v2414_v27, %v1542_v46  ;;  %vm1549_vm6 = vweird.f32 %v2414_v27 }
 0x436   :  { %v1564_v36 = vmul.f32 %v2416_v63, %v1562_v4  ;;  %vm1550_vm8 = vmor %vm1548_vm7, %vm1549_vm6  ;;  %vm1569_vm10 = vweird.f32 %v2416_v63  ;;  %v1258_v4 = vadd.f32 %v3502_v26, %v3518_v24 }
 0x437   :  { %v1545_v32 = vsub.f32 1.0, %v1544_v25  ;;  %vm1570_vm12 = vmor %vm1568_vm11, %vm1569_vm10 }
 0x438   :  { %v1565_v19 = vsub.f32 1.0, %v1564_v36 }
 0x439   :  { %v1546_v40 = vmul.f32 %v2414_v27, %v1545_v32 }
 0x43a   :  { %v1566_v31 = vmul.f32 %v2416_v63, %v1565_v19 }
 0x43b   :  { %v1547_v49 = vadd.f32 %v2414_v27, %v1546_v40 }
 0x43c   :  { %v1567_v22 = vadd.f32 %v2416_v63, %v1566_v31 }
 0x43d   :  { %v1551_v55 = vsel %vm1550_vm8, %v2414_v27, %v1547_v49  ;;  %v1299_v27 = vadd.f32 %v3492_v9, %v3526_v42 }
 0x43e   :  { %v1556_v20 = vsel %vm1553_vm9, %v1555_v51, %v1551_v55  ;;  %v1571_v15 = vsel %vm1570_vm12, %v2416_v63, %v1567_v22 }
 0x43f   :  { %v1578_v0 = vmul.f32 %v1556_v20, %v1536_v54  ;;  %v1576_v29 = vsel %vm1573_vm14, %v1575_v3, %v1571_v15 }
 0x440   :  { %v1581_v33 = vsub.f32 1.0, %v1576_v29  ;;  %v1583_v11 = vmul.f32 %v1576_v29, %v3543_v61 }
 0x441   :  { %v1579_v2 = vadd.f32 %v1578_v0, %v1337_v60 }
 0x443   :  { %2417 = vtanh.f32 %v1579_v2 }
 0x449   :  { %v2418_v6 = vpop.eup %2417 }
 0x44a   :  { %v1582_v39 = vmul.f32 %v2418_v6, %v1581_v33  ;;  %v1340_v6 = vadd.f32 %v1339_v52, %v3538_v5 }
 0x44c   :  { %v3574_v13 = vadd.f32 %v1583_v11, %v1582_v39 }
 0x44e   :  { %1586 = vst.msk [vmem:[#allocation2 + $0x8] sm:$0xff] %vm1209_vm13, %v3574_v13  ;;  %2313 = vmatmul.msk.f32.vlgmr.msra.gmra.mxu0 %vm1209_vm13, %v3574_v13  ;;  %2314 = vmatmul.msk.f32.vlgmr.msra.gmra.mxu1 %vm1209_vm13, %v3574_v13 }
 0x44f   :  { %2315 = vmatmul.msk.f32.vlgmr.msrb.gmra.mxu3 %vm1209_vm13, %v3574_v13  ;;  %1826 = vmatpush.msra.mxu0 %v3300_v12 }
 0x450   :  { %1846 = vmatpush.msra.mxu1 %v3386_v43  ;;  %1866 = vmatpush.msrb.mxu3 %v3427_v7 }
 0x451   :  { %1827 = vmatpush.msra.mxu0 %v3317_v34 }
 0x452   :  { %1847 = vmatpush.msra.mxu1 %v3396_v21  ;;  %1867 = vmatpush.msrb.mxu3 %v3438_v56 }
 0x453   :  { %1828 = vmatpush.msra.mxu0 %v3335_v45 }
 0x454   :  { %1848 = vmatpush.msra.mxu1 %v3401_v57  ;;  %1868 = vmatpush.msrb.mxu3 %v3444_v10 }
 0x455   :  { %1829 = vmatpush.msra.mxu0 %v3356_v16 }
 0x456   :  { %1849 = vmatpush.msra.mxu1 %v3409_v59  ;;  %1869 = vmatpush.msrb.mxu3 %v3450_v53 }
 0x4cb   :  { %v1607_v61 = vpop.f32.mrf.mxu0  ;;  %v1627_v46 = vpop.f32.mrf.mxu1 }
 0x4cc   :  { %v1608_v63 = vadd.f32 %v1607_v61, %v3520_v8  ;;  %v1628_v25 = vadd.f32 %v1627_v46, %v3528_v47 }
 0x4ce   :  { %v1650_v36 = vadd.f32 %v1608_v63, %v1258_v4  ;;  %v1670_v32 = vadd.f32 %v1628_v25, %v1299_v27 }
 0x4d0   :  { %v2316_v19 = vmul.f32 -1.442695, %v1650_v36  ;;  %v2317_v38 = vmul.f32 -1.442695, %v1670_v32 }
 0x4d2   :  { %2419 = vpow2.f32 %v2316_v19  ;;  %v1647_v17 = vpop.f32.mrf.mxu3 }
 0x4d3   :  { %2421 = vpow2.f32 %v2317_v38  ;;  %v1648_v15 = vadd.f32 %v1647_v17, %v3536_v1 }
 0x4d8   :  { %v2420_v40 = vpop.eup %2419 }
 0x4d9   :  { %v2422_v37 = vpop.eup %2421  ;;  %v1654_v31 = vadd.f32 1.0, %v2420_v40 }
 0x4da   :  { %v1674_v23 = vadd.f32 1.0, %v2422_v37  ;;  %v1261_v37 = vadd.f32 %v3506_v28, %v3518_v24 }
 0x4db   :  { %2423 = vrcp.f32 %v1654_v31  ;;  %v1666_v55 = vand.u32 2147483648, %v1654_v31  ;;  %v1664_v22 = vand.u32 2147483647, %v1654_v31  ;;  %vm1660_vm0 = vweird.f32 %v1654_v31 }
 0x4dc   :  { %2425 = vrcp.f32 %v1674_v23  ;;  %v1686_v39 = vand.u32 2147483648, %v1674_v23  ;;  %vm1680_vm4 = vweird.f32 %v1674_v23  ;;  %v1684_v61 = vand.u32 2147483647, %v1674_v23 }
 0x4dd   :  { %v1667_v2 = vor.u32 1.1754944e-38, %v1666_v55  ;;  %vm1665_vm2 = vcmp.eq.f32.partialorder %v1664_v22, 8.507059e+37 }
 0x4de   :  { %v1687_v27 = vor.u32 1.1754944e-38, %v1686_v39  ;;  %vm1685_vm6 = vcmp.eq.f32.partialorder %v1684_v61, 8.507059e+37  ;;  %v1342_v39 = vpop.f32.mrf.mxu2 }
 0x4e1   :  { %v2424_v26 = vpop.eup %2423 }
 0x4e2   :  { %v2426_v49 = vpop.eup %2425  ;;  %v1656_v50 = vmul.f32 %v2424_v26, %v1654_v31  ;;  %vm1661_vm15 = vweird.f32 %v2424_v26  ;;  %v1302_v31 = vadd.f32 %v3494_v18, %v3526_v42 }
 0x4e3   :  { %v1676_v9 = vmul.f32 %v2426_v49, %v1674_v23  ;;  %vm1662_vm1 = vmor %vm1660_vm0, %vm1661_vm15  ;;  %vm1681_vm3 = vweird.f32 %v2426_v49 }
 0x4e4   :  { %v1657_v51 = vsub.f32 1.0, %v1656_v50  ;;  %vm1682_vm5 = vmor %vm1680_vm4, %vm1681_vm3 }
 0x4e5   :  { %v1677_v54 = vsub.f32 1.0, %v1676_v9 }
 0x4e6   :  { %v1658_v20 = vmul.f32 %v2424_v26, %v1657_v51 }
 0x4e7   :  { %v1678_v60 = vmul.f32 %v2426_v49, %v1677_v54 }
 0x4e8   :  { %v1659_v0 = vadd.f32 %v2424_v26, %v1658_v20 }
 0x4e9   :  { %v1679_v33 = vadd.f32 %v2426_v49, %v1678_v60 }
 0x4ea   :  { %v1663_v3 = vsel %vm1662_vm1, %v2424_v26, %v1659_v0 }
 0x4eb   :  { %v1668_v29 = vsel %vm1665_vm2, %v1667_v2, %v1663_v3  ;;  %v1683_v4 = vsel %vm1682_vm5, %v2426_v49, %v1679_v33 }
 0x4ec   :  { %v1690_v11 = vmul.f32 %v1668_v29, %v1648_v15  ;;  %v1688_v63 = vsel %vm1685_vm6, %v1687_v27, %v1683_v4 }
 0x4ed   :  { %v1693_v25 = vsub.f32 1.0, %v1688_v63  ;;  %v1695_v19 = vmul.f32 %v1688_v63, %v3574_v13  ;;  %v1343_v63 = vadd.f32 %v1342_v39, %v3538_v5 }
 0x4ee   :  { %v1691_v46 = vadd.f32 %v1690_v11, %v1340_v6 }
 0x4f0   :  { %2427 = vtanh.f32 %v1691_v46 }
 0x4f6   :  { %v2428_v36 = vpop.eup %2427 }
 0x4f7   :  { %v1694_v32 = vmul.f32 %v2428_v36, %v1693_v25 }
 0x4f9   :  { %v3605_v38 = vadd.f32 %v1695_v19, %v1694_v32 }
 0x4fb   :  { %1698 = vst.msk [vmem:[#allocation2 + $0x10] sm:$0xff] %vm1209_vm13, %v3605_v38  ;;  %2318 = vmatmul.msk.f32.vlgmr.msrb.gmra.mxu0 %vm1209_vm13, %v3605_v38  ;;  %2319 = vmatmul.msk.f32.vlgmr.msrb.gmra.mxu1 %vm1209_vm13, %v3605_v38 }
 0x4fc   :  { %2320 = vmatmul.msk.f32.vlgmr.msra.gmra.mxu3 %vm1209_vm13, %v3605_v38  ;;  %1938 = vmatpush.msrb.mxu0 %v3300_v12 }
 0x4fd   :  { %1958 = vmatpush.msrb.mxu1 %v3386_v43  ;;  %1978 = vmatpush.msra.mxu3 %v3427_v7 }
 0x4fe   :  { %1939 = vmatpush.msrb.mxu0 %v3317_v34 }
 0x4ff   :  { %1959 = vmatpush.msrb.mxu1 %v3396_v21  ;;  %1979 = vmatpush.msra.mxu3 %v3438_v56 }
 0x500   :  { %1940 = vmatpush.msrb.mxu0 %v3335_v45 }
 0x501   :  { %1960 = vmatpush.msrb.mxu1 %v3401_v57  ;;  %1980 = vmatpush.msra.mxu3 %v3444_v10 }
 0x502   :  { %1941 = vmatpush.msrb.mxu0 %v3356_v16 }
 0x503   :  { %1961 = vmatpush.msrb.mxu1 %v3409_v59  ;;  %1981 = vmatpush.msra.mxu3 %v3450_v53 }
 0x578   :  { %v1719_v13 = vpop.f32.mrf.mxu0  ;;  %v1739_v40 = vpop.f32.mrf.mxu1 }
 0x579   :  { %v1720_v23 = vadd.f32 %v1719_v13, %v3520_v8  ;;  %v1740_v26 = vadd.f32 %v1739_v40, %v3528_v47 }
 0x57b   :  { %v1762_v49 = vadd.f32 %v1720_v23, %v1261_v37  ;;  %v1782_v50 = vadd.f32 %v1740_v26, %v1302_v31 }
 0x57d   :  { %v2321_v9 = vmul.f32 -1.442695, %v1762_v49  ;;  %v2322_v51 = vmul.f32 -1.442695, %v1782_v50 }
 0x57f   :  { %2429 = vpow2.f32 %v2321_v9  ;;  %v1759_v33 = vpop.f32.mrf.mxu3  ;;  %v1264_v9 = vadd.f32 %v3516_v35, %v3518_v24 }
 0x580   :  { %2431 = vpow2.f32 %v2322_v51  ;;  %v1760_v61 = vadd.f32 %v1759_v33, %v3536_v1 }
 0x585   :  { %v2430_v54 = vpop.eup %2429 }
 0x586   :  { %v2432_v55 = vpop.eup %2431  ;;  %v1766_v20 = vadd.f32 1.0, %v2430_v54 }
 0x587   :  { %v1786_v22 = vadd.f32 1.0, %v2432_v55 }
 0x588   :  { %2433 = vrcp.f32 %v1766_v20  ;;  %v1778_v2 = vand.u32 2147483648, %v1766_v20  ;;  %v1776_v3 = vand.u32 2147483647, %v1766_v20  ;;  %vm1772_vm8 = vweird.f32 %v1766_v20 }
 0x589   :  { %2435 = vrcp.f32 %v1786_v22  ;;  %v1798_v25 = vand.u32 2147483648, %v1786_v22  ;;  %vm1792_vm12 = vweird.f32 %v1786_v22  ;;  %v1796_v32 = vand.u32 2147483647, %v1786_v22 }
 0x58a   :  { %v1779_v11 = vor.u32 1.1754944e-38, %v1778_v2  ;;  %vm1777_vm10 = vcmp.eq.f32.partialorder %v1776_v3, 8.507059e+37 }
 0x58b   :  { %v1799_v40 = vor.u32 1.1754944e-38, %v1798_v25  ;;  %vm1797_vm15 = vcmp.eq.f32.partialorder %v1796_v32, 8.507059e+37 }
 0x58e   :  { %v2434_v28 = vpop.eup %2433 }
 0x58f   :  { %v2436_v60 = vpop.eup %2435  ;;  %v1768_v17 = vmul.f32 %v2434_v28, %v1766_v20  ;;  %vm1773_vm7 = vweird.f32 %v2434_v28 }
 0x590   :  { %v1788_v18 = vmul.f32 %v2436_v60, %v1786_v22  ;;  %vm1774_vm9 = vmor %vm1772_vm8, %vm1773_vm7  ;;  %vm1793_vm11 = vweird.f32 %v2436_v60 }
 0x591   :  { %v1769_v0 = vsub.f32 1.0, %v1768_v17  ;;  %vm1794_vm14 = vmor %vm1792_vm12, %vm1793_vm11 }
 0x592   :  { %v1789_v52 = vsub.f32 1.0, %v1788_v18 }
 0x593   :  { %v1770_v15 = vmul.f32 %v2434_v28, %v1769_v0 }
 0x594   :  { %v1790_v29 = vmul.f32 %v2436_v60, %v1789_v52 }
 0x595   :  { %v1771_v6 = vadd.f32 %v2434_v28, %v1770_v15 }
 0x596   :  { %v1791_v27 = vadd.f32 %v2436_v60, %v1790_v29 }
 0x597   :  { %v1775_v46 = vsel %vm1774_vm9, %v2434_v28, %v1771_v6 }
 0x598   :  { %v1780_v4 = vsel %vm1777_vm10, %v1779_v11, %v1775_v46  ;;  %v1795_v13 = vsel %vm1794_vm14, %v2436_v60, %v1791_v27  ;;  %v1345_v11 = vpop.f32.mrf.mxu2 }
 0x599   :  { %v1802_v36 = vmul.f32 %v1780_v4, %v1760_v61  ;;  %v1800_v37 = vsel %vm1797_vm15, %v1799_v40, %v1795_v13  ;;  %v1346_v25 = vadd.f32 %v1345_v11, %v3538_v5 }
 0x59a   :  { %v1805_v31 = vsub.f32 1.0, %v1800_v37  ;;  %v1807_v49 = vmul.f32 %v1800_v37, %v3605_v38 }
 0x59b   :  { %v1803_v19 = vadd.f32 %v1802_v36, %v1343_v63 }
 0x59d   :  { %2437 = vtanh.f32 %v1803_v19 }
 0x5a3   :  { %v2438_v23 = vpop.eup %2437 }
 0x5a4   :  { %v1806_v26 = vmul.f32 %v2438_v23, %v1805_v31 }
 0x5a6   :  { %v3636_v50 = vadd.f32 %v1807_v49, %v1806_v26 }
 0x5a8   :  { %1810 = vst.msk [vmem:[#allocation2 + $0x18] sm:$0xff] %vm1209_vm13, %v3636_v50  ;;  %2323 = vmatmul.msk.f32.vlgmr.msra.gmra.mxu0 %vm1209_vm13, %v3636_v50  ;;  %2324 = vmatmul.msk.f32.vlgmr.msra.gmra.mxu1 %vm1209_vm13, %v3636_v50 }
 0x5a9   :  { %2325 = vmatmul.msk.f32.vlgmr.msrb.gmra.mxu3 %vm1209_vm13, %v3636_v50  ;;  %2050 = vmatpush.msra.mxu0 %v3300_v12 }
 0x5aa   :  { %2070 = vmatpush.msra.mxu1 %v3386_v43  ;;  %2162 = vmatpush.msrb.mxu3 %v3300_v12 }
 0x5ab   :  { %2051 = vmatpush.msra.mxu0 %v3317_v34 }
 0x5ac   :  { %2071 = vmatpush.msra.mxu1 %v3396_v21  ;;  %2163 = vmatpush.msrb.mxu3 %v3317_v34  ;;  %v1305_v34 = vadd.f32 %v3496_v14, %v3526_v42 }
 0x5ad   :  { %2052 = vmatpush.msra.mxu0 %v3335_v45 }
 0x5ae   :  { %2072 = vmatpush.msra.mxu1 %v3401_v57  ;;  %2164 = vmatpush.msrb.mxu3 %v3335_v45 }
 0x5af   :  { %2053 = vmatpush.msra.mxu0 %v3356_v16 }
 0x5b0   :  { %2073 = vmatpush.msra.mxu1 %v3409_v59  ;;  %2165 = vmatpush.msrb.mxu3 %v3356_v16 }
 0x625   :  { %v1831_v38 = vpop.f32.mrf.mxu0  ;;  %v1851_v12 = vpop.f32.mrf.mxu1 }
 0x626   :  { %v1832_v51 = vadd.f32 %v1831_v38, %v3520_v8  ;;  %v1852_v54 = vadd.f32 %v1851_v12, %v3528_v47 }
 0x628   :  { %v1874_v55 = vadd.f32 %v1832_v51, %v1264_v9  ;;  %v1894_v45 = vadd.f32 %v1852_v54, %v1305_v34  ;;  %v1267_v34 = vadd.f32 %v3524_v41, %v3518_v24 }
 0x62a   :  { %v2326_v20 = vmul.f32 -1.442695, %v1874_v55  ;;  %v2327_v22 = vmul.f32 -1.442695, %v1894_v45 }
 0x62c   :  { %2439 = vpow2.f32 %v2326_v20  ;;  %v1871_v6 = vpop.f32.mrf.mxu3 }
 0x62d   :  { %2441 = vpow2.f32 %v2327_v22  ;;  %v1872_v46 = vadd.f32 %v1871_v6, %v3536_v1 }
 0x632   :  { %v2440_v28 = vpop.eup %2439 }
 0x633   :  { %v2442_v16 = vpop.eup %2441  ;;  %v1878_v60 = vadd.f32 1.0, %v2440_v28 }
 0x634   :  { %v1898_v17 = vadd.f32 1.0, %v2442_v16 }
 0x635   :  { %2443 = vrcp.f32 %v1878_v60  ;;  %v1890_v15 = vand.u32 2147483648, %v1878_v60  ;;  %v1888_v29 = vand.u32 2147483647, %v1878_v60  ;;  %vm1884_vm1 = vweird.f32 %v1878_v60 }
 0x636   :  { %2445 = vrcp.f32 %v1898_v17  ;;  %v1910_v36 = vand.u32 2147483648, %v1898_v17  ;;  %vm1904_vm5 = vweird.f32 %v1898_v17  ;;  %v1908_v19 = vand.u32 2147483647, %v1898_v17 }
 0x637   :  { %v1891_v61 = vor.u32 1.1754944e-38, %v1890_v15  ;;  %vm1889_vm3 = vcmp.eq.f32.partialorder %v1888_v29, 8.507059e+37 }
 0x638   :  { %v1911_v37 = vor.u32 1.1754944e-38, %v1910_v36  ;;  %vm1909_vm7 = vcmp.eq.f32.partialorder %v1908_v19, 8.507059e+37 }
 0x63b   :  { %v2444_v35 = vpop.eup %2443 }
 0x63c   :  { %v2446_v18 = vpop.eup %2445  ;;  %v1880_v0 = vmul.f32 %v2444_v35, %v1878_v60  ;;  %vm1885_vm0 = vweird.f32 %v2444_v35 }
 0x63d   :  { %v1900_v14 = vmul.f32 %v2446_v18, %v1898_v17  ;;  %vm1886_vm2 = vmor %vm1884_vm1, %vm1885_vm0  ;;  %vm1905_vm4 = vweird.f32 %v2446_v18 }
 0x63e   :  { %v1881_v52 = vsub.f32 1.0, %v1880_v0  ;;  %vm1906_vm6 = vmor %vm1904_vm5, %vm1905_vm4 }
 0x63f   :  { %v1901_v2 = vsub.f32 1.0, %v1900_v14  ;;  %v1348_v14 = vpop.f32.mrf.mxu2 }
 0x640   :  { %v1882_v3 = vmul.f32 %v2444_v35, %v1881_v52 }
 0x641   :  { %v1902_v33 = vmul.f32 %v2446_v18, %v1901_v2 }
 0x642   :  { %v1883_v39 = vadd.f32 %v2444_v35, %v1882_v3 }
 0x643   :  { %v1903_v63 = vadd.f32 %v2446_v18, %v1902_v33  ;;  %v1349_v33 = vadd.f32 %v1348_v14, %v3538_v5 }
 0x644   :  { %v1887_v4 = vsel %vm1886_vm2, %v2444_v35, %v1883_v39 }
 0x645   :  { %v1892_v27 = vsel %vm1889_vm3, %v1891_v61, %v1887_v4  ;;  %v1907_v40 = vsel %vm1906_vm6, %v2446_v18, %v1903_v63 }
 0x646   :  { %v1914_v32 = vmul.f32 %v1892_v27, %v1872_v46  ;;  %v1912_v31 = vsel %vm1909_vm7, %v1911_v37, %v1907_v40  ;;  %v1270_v37 = vadd.f32 %v3532_v44, %v3518_v24 }
 0x647   :  { %v1917_v23 = vsub.f32 1.0, %v1912_v31  ;;  %v1919_v38 = vmul.f32 %v1912_v31, %v3636_v50  ;;  %v1311_v31 = vadd.f32 %v3504_v62, %v3526_v42 }
 0x648   :  { %v1915_v13 = vadd.f32 %v1914_v32, %v1346_v25 }
 0x64a   :  { %2447 = vtanh.f32 %v1915_v13 }
 0x650   :  { %v2448_v26 = vpop.eup %2447 }
 0x651   :  { %v1918_v49 = vmul.f32 %v2448_v26, %v1917_v23 }
 0x653   :  { %v3667_v12 = vadd.f32 %v1919_v38, %v1918_v49 }
 0x655   :  { %1922 = vst.msk [vmem:[#allocation2 + $0x20] sm:$0xff] %vm1209_vm13, %v3667_v12  ;;  %2328 = vmatmul.msk.f32.vlgmr.msrb.gmra.mxu0 %vm1209_vm13, %v3667_v12  ;;  %2329 = vmatmul.msk.f32.vlgmr.msrb.gmra.mxu1 %vm1209_vm13, %v3667_v12 }
 0x656   :  { %2330 = vmatmul.msk.f32.vlgmr.msra.gmra.mxu3 %vm1209_vm13, %v3667_v12  ;;  %2182 = vmatpush.msrb.mxu0 %v3386_v43  ;;  %v1308_v43 = vadd.f32 %v3500_v48, %v3526_v42 }
 0x657   :  { %2202 = vmatpush.msrb.mxu1 %v3427_v7 }
 0x658   :  { %2183 = vmatpush.msrb.mxu0 %v3396_v21 }
 0x659   :  { %2203 = vmatpush.msrb.mxu1 %v3438_v56 }
 0x65a   :  { %2184 = vmatpush.msrb.mxu0 %v3401_v57 }
 0x65b   :  { %2204 = vmatpush.msrb.mxu1 %v3444_v10 }
 0x65c   :  { %2185 = vmatpush.msrb.mxu0 %v3409_v59 }
 0x65d   :  { %2205 = vmatpush.msrb.mxu1 %v3450_v53 }
 0x6d2   :  { %v1943_v50 = vpop.f32.mrf.mxu0  ;;  %v1963_v9 = vpop.f32.mrf.mxu1 }
 0x6d3   :  { %v1944_v21 = vadd.f32 %v1943_v50, %v3520_v8  ;;  %v1964_v7 = vadd.f32 %v1963_v9, %v3528_v47  ;;  %v1351_v9 = vpop.f32.mrf.mxu2 }
 0x6d5   :  { %v1986_v56 = vadd.f32 %v1944_v21, %v1267_v34  ;;  %v2006_v57 = vadd.f32 %v1964_v7, %v1308_v43 }
 0x6d7   :  { %v2331_v51 = vmul.f32 -1.442695, %v1986_v56  ;;  %v2332_v10 = vmul.f32 -1.442695, %v2006_v57 }
 0x6d9   :  { %2449 = vpow2.f32 %v2331_v51  ;;  %v1983_v18 = vpop.f32.mrf.mxu3 }
 0x6da   :  { %2451 = vpow2.f32 %v2332_v10  ;;  %v1984_v2 = vadd.f32 %v1983_v18, %v3536_v1 }
 0x6db   :  { %v3704_v44 = vpop.f32.mrf.mxu2 }
 0x6df   :  { %v2450_v59 = vpop.eup %2449 }
 0x6e0   :  { %v2452_v53 = vpop.eup %2451  ;;  %v1990_v54 = vadd.f32 1.0, %v2450_v59 }
 0x6e1   :  { %v2010_v55 = vadd.f32 1.0, %v2452_v53 }
 0x6e2   :  { %2453 = vrcp.f32 %v1990_v54  ;;  %v2002_v16 = vand.u32 2147483648, %v1990_v54  ;;  %v2000_v17 = vand.u32 2147483647, %v1990_v54  ;;  %vm1996_vm9 = vweird.f32 %v1990_v54 }
 0x6e3   :  { %2455 = vrcp.f32 %v2010_v55  ;;  %v2022_v6 = vand.u32 2147483648, %v2010_v55  ;;  %vm2016_vm14 = vweird.f32 %v2010_v55  ;;  %v2020_v11 = vand.u32 2147483647, %v2010_v55 }
 0x6e4   :  { %v2003_v52 = vor.u32 1.1754944e-38, %v2002_v16  ;;  %vm2001_vm11 = vcmp.eq.f32.partialorder %v2000_v17, 8.507059e+37  ;;  %v1352_v17 = vadd.f32 %v1351_v9, %v3538_v5 }
 0x6e5   :  { %v2023_v4 = vor.u32 1.1754944e-38, %v2022_v6  ;;  %vm2021_vm0 = vcmp.eq.f32.partialorder %v2020_v11, 8.507059e+37 }
 0x6e8   :  { %v2454_v41 = vpop.eup %2453 }
 0x6e9   :  { %v2456_v45 = vpop.eup %2455  ;;  %v1992_v20 = vmul.f32 %v2454_v41, %v1990_v54  ;;  %vm1997_vm8 = vweird.f32 %v2454_v41 }
 0x6ea   :  { %v2012_v48 = vmul.f32 %v2456_v45, %v2010_v55  ;;  %vm1998_vm10 = vmor %vm1996_vm9, %vm1997_vm8  ;;  %vm2017_vm12 = vweird.f32 %v2456_v45 }
 0x6eb   :  { %v1993_v22 = vsub.f32 1.0, %v1992_v20  ;;  %vm2018_vm15 = vmor %vm2016_vm14, %vm2017_vm12 }
 0x6ec   :  { %v2013_v28 = vsub.f32 1.0, %v2012_v48 }
 0x6ed   :  { %v1994_v60 = vmul.f32 %v2454_v41, %v1993_v22 }
 0x6ee   :  { %v2014_v35 = vmul.f32 %v2456_v45, %v2013_v28 }
 0x6ef   :  { %v1995_v0 = vadd.f32 %v2454_v41, %v1994_v60 }
 0x6f0   :  { %v2015_v29 = vadd.f32 %v2456_v45, %v2014_v35 }
 0x6f1   :  { %v1999_v15 = vsel %vm1998_vm10, %v2454_v41, %v1995_v0 }
 0x6f2   :  { %v2004_v3 = vsel %vm2001_vm11, %v2003_v52, %v1999_v15  ;;  %v2019_v46 = vsel %vm2018_vm15, %v2456_v45, %v2015_v29 }
 0x6f3   :  { %v2026_v39 = vmul.f32 %v2004_v3, %v1984_v2  ;;  %v2024_v27 = vsel %vm2021_vm0, %v2023_v4, %v2019_v46 }
 0x6f4   :  { %v2029_v63 = vsub.f32 1.0, %v2024_v27  ;;  %v2031_v32 = vmul.f32 %v2024_v27, %v3667_v12 }
 0x6f5   :  { %v2027_v61 = vadd.f32 %v2026_v39, %v1349_v33 }
 0x6f7   :  { %2457 = vtanh.f32 %v2027_v61  ;;  %v1314_v61 = vadd.f32 %v3508_v30, %v3526_v42 }
 0x6fd   :  { %v2458_v25 = vpop.eup %2457 }
 0x6fe   :  { %v2030_v36 = vmul.f32 %v2458_v25, %v2029_v63  ;;  %v1273_v25 = vadd.f32 %v3534_v58, %v3518_v24 }
 0x700   :  { %v2032_v19 = vadd.f32 %v2031_v32, %v2030_v36 }
 0x702   :  { %2034 = vst.msk [vmem:[#allocation2 + $0x28] sm:$0xff] %vm1209_vm13, %v2032_v19  ;;  %2333 = vmatmul.msk.f32.vlgmr.msra.gmra.mxu0 %vm1209_vm13, %v2032_v19  ;;  %2334 = vmatmul.msk.f32.vlgmr.msra.gmra.mxu1 %vm1209_vm13, %v2032_v19 }
 0x703   :  { %2335 = vmatmul.msk.f32.vlgmr.msra.gmra.mxu2 %vm1209_vm13, %v2032_v19 }
 0x77f   :  { %v2055_v13 = vpop.f32.mrf.mxu0  ;;  %v2075_v40 = vpop.f32.mrf.mxu1 }
 0x780   :  { %v2056_v23 = vadd.f32 %v2055_v13, %v3520_v8  ;;  %v2076_v26 = vadd.f32 %v2075_v40, %v3528_v47 }
 0x782   :  { %v2098_v49 = vadd.f32 %v2056_v23, %v1270_v37  ;;  %v2118_v38 = vadd.f32 %v2076_v26, %v1311_v31 }
 0x784   :  { %v2336_v12 = vmul.f32 -1.442695, %v2098_v49  ;;  %v2337_v50 = vmul.f32 -1.442695, %v2118_v38 }
 0x786   :  { %2459 = vpow2.f32 %v2336_v12  ;;  %v2095_v45 = vpop.f32.mrf.mxu2 }
 0x787   :  { %2461 = vpow2.f32 %v2337_v50  ;;  %v2096_v22 = vadd.f32 %v2095_v45, %v3536_v1 }
 0x78c   :  { %v2460_v34 = vpop.eup %2459 }
 0x78d   :  { %v2462_v43 = vpop.eup %2461  ;;  %v2102_v21 = vadd.f32 1.0, %v2460_v34 }
 0x78e   :  { %v2122_v7 = vadd.f32 1.0, %v2462_v43 }
 0x78f   :  { %2463 = vrcp.f32 %v2102_v21  ;;  %v2114_v53 = vand.u32 2147483648, %v2102_v21  ;;  %v2112_v55 = vand.u32 2147483647, %v2102_v21  ;;  %vm2108_vm2 = vweird.f32 %v2102_v21 }
 0x790   :  { %2465 = vrcp.f32 %v2122_v7  ;;  %v2134_v35 = vand.u32 2147483648, %v2122_v7  ;;  %vm2128_vm6 = vweird.f32 %v2122_v7  ;;  %v2132_v0 = vand.u32 2147483647, %v2122_v7 }
 0x791   :  { %v2115_v48 = vor.u32 1.1754944e-38, %v2114_v53  ;;  %vm2113_vm4 = vcmp.eq.f32.partialorder %v2112_v55, 8.507059e+37 }
 0x792   :  { %v2135_v2 = vor.u32 1.1754944e-38, %v2134_v35  ;;  %vm2133_vm8 = vcmp.eq.f32.partialorder %v2132_v0, 8.507059e+37 }
 0x795   :  { %v2464_v62 = vpop.eup %2463 }
 0x796   :  { %v2466_v56 = vpop.eup %2465  ;;  %v2104_v57 = vmul.f32 %v2464_v62, %v2102_v21  ;;  %vm2109_vm1 = vweird.f32 %v2464_v62 }
 0x797   :  { %v2124_v51 = vmul.f32 %v2466_v56, %v2122_v7  ;;  %vm2110_vm3 = vmor %vm2108_vm2, %vm2109_vm1  ;;  %vm2129_vm5 = vweird.f32 %v2466_v56 }
 0x798   :  { %v2105_v10 = vsub.f32 1.0, %v2104_v57  ;;  %vm2130_vm7 = vmor %vm2128_vm6, %vm2129_vm5 }
 0x799   :  { %v2125_v59 = vsub.f32 1.0, %v2124_v51 }
 0x79a   :  { %v2106_v54 = vmul.f32 %v2464_v62, %v2105_v10 }
 0x79b   :  { %v2126_v41 = vmul.f32 %v2466_v56, %v2125_v59 }
 0x79c   :  { %v2107_v20 = vadd.f32 %v2464_v62, %v2106_v54 }
 0x79d   :  { %v2127_v60 = vadd.f32 %v2466_v56, %v2126_v41 }
 0x79e   :  { %v2111_v28 = vsel %vm2110_vm3, %v2464_v62, %v2107_v20  ;;  %v1355_v62 = vadd.f32 %v3704_v44, %v3538_v5 }
 0x79f   :  { %v2116_v16 = vsel %vm2113_vm4, %v2115_v48, %v2111_v28  ;;  %v2131_v52 = vsel %vm2130_vm7, %v2466_v56, %v2127_v60 }
 0x7a0   :  { %v2138_v18 = vmul.f32 %v2116_v16, %v2096_v22  ;;  %v2136_v15 = vsel %vm2133_vm8, %v2135_v2, %v2131_v52 }
 0x7a1   :  { %v2141_v3 = vsub.f32 1.0, %v2136_v15  ;;  %v2143_v6 = vmul.f32 %v2136_v15, %v2032_v19 }
 0x7a2   :  { %v2139_v14 = vadd.f32 %v2138_v18, %v1352_v17 }
 0x7a4   :  { %2467 = vtanh.f32 %v2139_v14 }
 0x7aa   :  { %v2468_v29 = vpop.eup %2467 }
 0x7ab   :  { %v2142_v33 = vmul.f32 %v2468_v29, %v2141_v3 }
 0x7ad   :  { %v2144_v39 = vadd.f32 %v2143_v6, %v2142_v33 }
 0x7af   :  { %2146 = vst.msk [vmem:[#allocation2 + $0x30] sm:$0xff] %vm1209_vm13, %v2144_v39  ;;  %2338 = vmatmul.msk.f32.vlgmr.msrb.gmra.mxu3 %vm1209_vm13, %v2144_v39  ;;  %2339 = vmatmul.msk.f32.vlgmr.msrb.gmra.mxu0 %vm1209_vm13, %v2144_v39 }
 0x7b0   :  { %2340 = vmatmul.msk.f32.vlgmr.msrb.gmra.mxu1 %vm1209_vm13, %v2144_v39 }
 0x82c   :  { %v2187_v11 = vpop.f32.mrf.mxu0 }
 0x82d   :  { %v2188_v46 = vadd.f32 %v2187_v11, %v3528_v47  ;;  %v2207_v12 = vpop.f32.mrf.mxu1 }
 0x82e   :  { %v2208_v34 = vadd.f32 %v2207_v12, %v3536_v1 }
 0x82f   :  { %v2230_v4 = vadd.f32 %v2188_v46, %v1314_v61 }
 0x831   :  { %v2342_v27 = vmul.f32 -1.442695, %v2230_v4 }
 0x832   :  { %v2167_v63 = vpop.f32.mrf.mxu3 }
 0x833   :  { %2469 = vpow2.f32 %v2342_v27  ;;  %v2168_v36 = vadd.f32 %v2167_v63, %v3520_v8 }
 0x835   :  { %v2210_v32 = vadd.f32 %v2168_v36, %v1273_v25 }
 0x837   :  { %v2341_v19 = vmul.f32 -1.442695, %v2210_v32 }
 0x839   :  { %v2470_v13 = vpop.eup %2469  ;;  %2471 = vpow2.f32 %v2341_v19 }
 0x83a   :  { %v2234_v40 = vadd.f32 1.0, %v2470_v13 }
 0x83c   :  { %2473 = vrcp.f32 %v2234_v40  ;;  %v2246_v56 = vand.u32 2147483648, %v2234_v40  ;;  %vm2240_vm15 = vweird.f32 %v2234_v40  ;;  %v2244_v51 = vand.u32 2147483647, %v2234_v40 }
 0x83e   :  { %v2247_v53 = vor.u32 1.1754944e-38, %v2246_v56  ;;  %vm2245_vm1 = vcmp.eq.f32.partialorder %v2244_v51, 8.507059e+37 }
 0x83f   :  { %v2472_v37 = vpop.eup %2471 }
 0x840   :  { %v2214_v31 = vadd.f32 1.0, %v2472_v37 }
 0x842   :  { %2475 = vrcp.f32 %v2214_v31  ;;  %v2474_v30 = vpop.eup %2473  ;;  %v2226_v38 = vand.u32 2147483648, %v2214_v31  ;;  %v2224_v58 = vand.u32 2147483647, %v2214_v31  ;;  %vm2220_vm10 = vweird.f32 %v2214_v31 }
 0x843   :  { %v2236_v42 = vmul.f32 %v2474_v30, %v2234_v40  ;;  %vm2241_vm14 = vweird.f32 %v2474_v30 }
 0x844   :  { %v2227_v9 = vor.u32 1.1754944e-38, %v2226_v38  ;;  %vm2225_vm12 = vcmp.eq.f32.partialorder %v2224_v58, 8.507059e+37  ;;  %vm2242_vm0 = vmor %vm2240_vm15, %vm2241_vm14 }
 0x845   :  { %v2237_v26 = vsub.f32 1.0, %v2236_v42 }
 0x847   :  { %v2238_v8 = vmul.f32 %v2474_v30, %v2237_v26 }
 0x848   :  { %v2476_v47 = vpop.eup %2475 }
 0x849   :  { %v2216_v23 = vmul.f32 %v2476_v47, %v2214_v31  ;;  %vm2221_vm9 = vweird.f32 %v2476_v47  ;;  %v2239_v21 = vadd.f32 %v2474_v30, %v2238_v8 }
 0x84a   :  { %vm2222_vm11 = vmor %vm2220_vm10, %vm2221_vm9 }
 0x84b   :  { %v2217_v49 = vsub.f32 1.0, %v2216_v23  ;;  %v2243_v59 = vsel %vm2242_vm0, %v2474_v30, %v2239_v21 }
 0x84c   :  { %v2248_v54 = vsel %vm2245_vm1, %v2247_v53, %v2243_v59 }
 0x84d   :  { %v2218_v24 = vmul.f32 %v2476_v47, %v2217_v49  ;;  %v2253_v1 = vsub.f32 1.0, %v2248_v54  ;;  %v2255_v5 = vmul.f32 %v2248_v54, %v2144_v39 }
 0x84f   :  { %v2219_v50 = vadd.f32 %v2476_v47, %v2218_v24 }
 0x851   :  { %v2223_v43 = vsel %vm2222_vm11, %v2476_v47, %v2219_v50 }
 0x852   :  { %v2228_v7 = vsel %vm2225_vm12, %v2227_v9, %v2223_v43 }
 0x853   :  { %v2250_v57 = vmul.f32 %v2228_v7, %v2208_v34 }
 0x855   :  { %v2251_v10 = vadd.f32 %v2250_v57, %v1355_v62 }
 0x857   :  { %2477 = vtanh.f32 %v2251_v10 }
 0x85d   :  { %v2478_v55 = vpop.eup %2477 }
 0x85e   :  { %v2254_v44 = vmul.f32 %v2478_v55, %v2253_v1 }
 0x860   :  { %v2256_v41 = vadd.f32 %v2255_v5, %v2254_v44 }
 0x862   :  { %2258 = vst.msk [vmem:[#allocation2 + $0x38] sm:$0xff] %vm1209_vm13, %v2256_v41 }
 0x863   :  { %2271 = dma.vmem_to_hbm [thread:$0]  %s2264_s7, 1024, %s2266_s10, [#allocation3], %s2506_s11, %s2506_s11, %s2507_s12  }
 0x864   :  { %2503 = dma.done.wait [#allocation3], 1024  }
 0x865   :  { %2504 = vsyncadd [#allocation3], 4294966272 }
 0x866   :  { %2276 = vsyncpa [#allocation3], 1 }

</bundles_post_ra>
